<compile_context>
chip_gen: v5e
topology: v5e:2x2
jax: 0.10.0
libtpu: 0.0.40
codegen_flags: <defaults>
</compile_context>

<pallas_src>
import jax
import jax.numpy as jnp
from jax.experimental import pallas as pl
from jax.experimental.pallas import tpu as pltpu


def _encoder_kernel(
    x_ref,            # (Bp, (T-1)*I)  time-packed driving series (lane-dense)
    sx_ref,           # (Bp, I)        time-invariant attention term + bias
    w_ihT_ref,        # (I, 4H)        LSTM input->gates weights, transposed
    w_hhT_ref,        # (H, 4H)        LSTM hidden->gates weights, transposed
    b_ref,            # (1, 4H)        b_ih + b_hh
    wh_ref,           # (1, H)         attention weight on h
    ws_ref,           # (1, H)         attention weight on s (cell state)
    x_tilde_out_ref,  # (Bp, (T-1)*I)  lane-packed outputs
    x_enc_out_ref,    # (Bp, (T-1)*H)
):
    Bp, I = sx_ref.shape
    H = wh_ref.shape[1]
    Tm1 = x_ref.shape[1] // I

    # ---- loop invariants, hoisted out of the recurrence --------------------
    x_all = x_ref[...]                                      # (Bp, Tm1*I)
    sx = sx_ref[...]                                        # (Bp, I)
    wh = jnp.broadcast_to(wh_ref[...], (Bp, H))             # (Bp, H)
    ws = jnp.broadcast_to(ws_ref[...], (Bp, H))             # (Bp, H)
    w_ihT = w_ihT_ref[...]                                  # (I, 4H)
    w_hhT = w_hhT_ref[...]                                  # (H, 4H)
    bias = b_ref[...]                                       # (1, 4H)
    # Per-gate weight / bias slices (PyTorch gate order i, f, g, o); sliced
    # once here so each per-step gate dot produces a lane-aligned (Bp, H) tile.
    wx_g = [w_ihT[:, g * H:(g + 1) * H] for g in range(4)]
    wr_g = [w_hhT[:, g * H:(g + 1) * H] for g in range(4)]
    b_g = [jnp.broadcast_to(bias[:, g * H:(g + 1) * H], (Bp, H))
           for g in range(4)]

    h = jnp.zeros((Bp, H), jnp.float32)
    c = jnp.zeros((Bp, H), jnp.float32)

    # Fully unrolled recurrence; every offset below is a static Python int.
    for t in range(Tm1):
        x_t = x_all[:, t * I:(t + 1) * I]                   # (Bp, I)

        # ---- input attention: softmax over the input_size axis ------------
        # one fused cross-lane (XLU) reduction for both state terms
        score = sx + jnp.sum(h * wh + c * ws, axis=1, keepdims=True)  # (Bp, I)
        m = jnp.max(score, axis=1, keepdims=True)
        e = jnp.exp(score - m)
        u = e * x_t                               # VPU mul overlaps EUP recip
        denom = jnp.sum(e, axis=1, keepdims=True)
        inv = pl.reciprocal(denom, approx=True)   # EUP slot
        inv = inv * (2.0 - denom * inv)           # 1 Newton step (holds 1e-3)
        x_tilde = u * inv                                   # (Bp, I)

        # ---- one LSTM step: per-gate MXU dots (no lane realignment) -------
        def gate(g):
            return (jnp.dot(x_tilde, wx_g[g],
                            preferred_element_type=jnp.float32)
                    + jnp.dot(h, wr_g[g],
                              preferred_element_type=jnp.float32)
                    + b_g[g])

        i_g = jax.nn.sigmoid(gate(0))
        f_g = jax.nn.sigmoid(gate(1))
        g_g = jnp.tanh(gate(2))
        o_g = jax.nn.sigmoid(gate(3))
        c = f_g * c + i_g * g_g
        h = o_g * jnp.tanh(c)

        # lane-packed output writes (off the serial critical path)
        x_tilde_out_ref[:, t * I:(t + 1) * I] = x_tilde
        x_enc_out_ref[:, t * H:(t + 1) * H] = h


def encoder_forward(X, w_ih, w_hh, b_ih, b_hh, attn_w, attn_b):
    """X: (B, T-1, I) float32. Returns (X_tilde (B,T-1,I), X_encoded (B,T-1,H))."""
    B, Tm1, I = X.shape
    H = w_hh.shape[1]
    assert w_ih.shape == (4 * H, I)
    assert attn_w.shape == (1, 2 * H + Tm1)

    # pad batch to a multiple of 8 sublanes (zero rows, sliced off at the end)
    Bp = max(8, ((B + 7) // 8) * 8)
    Xf = X.astype(jnp.float32)

    attn_wh = attn_w[:, :H].astype(jnp.float32)             # (1, H)
    attn_ws = attn_w[:, H:2 * H].astype(jnp.float32)        # (1, H)
    attn_wx = attn_w[0, 2 * H:].astype(jnp.float32)         # (T-1,)

    # time-packed, lane-dense layout: contiguous reshape, no transposes
    x_packed = Xf.reshape(B, Tm1 * I)                       # (B, (T-1)*I)
    # time-invariant part of the attention score (+ bias), hoisted out of the
    # recurrence: sx[b, i] = sum_t wx[t] * X[b, t, i] + attn_b
    sx = (jnp.einsum('bti,t->bi', Xf, attn_wx)
          + attn_b.reshape(()).astype(jnp.float32))          # (B, I)
    if Bp != B:
        x_packed = jnp.pad(x_packed, ((0, Bp - B), (0, 0)))
        sx = jnp.pad(sx, ((0, Bp - B), (0, 0)))

    # LSTM weights transposed for right-multiplication; kept f32 (not bf16) so
    # the 8-step recurrence holds the 1e-3 check; MXU has huge slack here.
    w_ihT = jnp.transpose(w_ih).astype(jnp.float32)          # (I, 4H)
    w_hhT = jnp.transpose(w_hh).astype(jnp.float32)          # (H, 4H)
    bias = (b_ih + b_hh).reshape(1, 4 * H).astype(jnp.float32)

    vmem = pl.BlockSpec(memory_space=pltpu.MemorySpace.VMEM)
    x_tilde_p, x_enc_p = pl.pallas_call(
        _encoder_kernel,
        out_shape=(jax.ShapeDtypeStruct((Bp, Tm1 * I), jnp.float32),
                   jax.ShapeDtypeStruct((Bp, Tm1 * H), jnp.float32)),
        in_specs=[vmem] * 7,
        out_specs=(vmem, vmem),
    )(x_packed, sx, w_ihT, w_hhT, bias, attn_wh, attn_ws)

    x_tilde = x_tilde_p[:B].reshape(B, Tm1, I)               # (B, T-1, I)
    x_enc = x_enc_p[:B].reshape(B, Tm1, H)                   # (B, T-1, H)
    return x_tilde, x_enc


def encoder_reference(X, w_ih, w_hh, b_ih, b_hh, attn_w, attn_b):
    """Pure-JAX reference matching the PyTorch forward exactly."""
    B, Tm1, I = X.shape
    H = w_hh.shape[1]
    wh = attn_w[0, :H]
    ws = attn_w[0, H:2 * H]
    wx = attn_w[0, 2 * H:]
    h = jnp.zeros((B, H), jnp.float32)
    c = jnp.zeros((B, H), jnp.float32)
    x_tildes, x_encs = [], []
    for t in range(Tm1):
        score = ((h @ wh)[:, None] + (c @ ws)[:, None]
                 + jnp.einsum('bti,t->bi', X, wx) + attn_b[0])
        alpha = jax.nn.softmax(score, axis=1)
        x_tilde = alpha * X[:, t, :]
        gates = x_tilde @ w_ih.T + h @ w_hh.T + b_ih + b_hh
        i_g = jax.nn.sigmoid(gates[:, :H])
        f_g = jax.nn.sigmoid(gates[:, H:2 * H])
        g_g = jnp.tanh(gates[:, 2 * H:3 * H])
        o_g = jax.nn.sigmoid(gates[:, 3 * H:4 * H])
        c = f_g * c + i_g * g_g
        h = o_g * jnp.tanh(c)
        x_tildes.append(x_tilde)
        x_encs.append(h)
    return jnp.stack(x_tildes, axis=1), jnp.stack(x_encs, axis=1)


if __name__ == "__main__":
    B, T, I, H = 4, 9, 16, 32   # batch, T, input_size, encoder_num_hidden
    Tm1 = T - 1

    key = jax.random.PRNGKey(0)
    ks = jax.random.split(key, 7)
    k_lstm = 1.0 / jnp.sqrt(jnp.float32(H))
    w_ih = jax.random.uniform(ks[0], (4 * H, I), jnp.float32, -k_lstm, k_lstm)
    w_hh = jax.random.uniform(ks[1], (4 * H, H), jnp.float32, -k_lstm, k_lstm)
    b_ih = jax.random.uniform(ks[2], (4 * H,), jnp.float32, -k_lstm, k_lstm)
    b_hh = jax.random.uniform(ks[3], (4 * H,), jnp.float32, -k_lstm, k_lstm)
    k_attn = 1.0 / jnp.sqrt(jnp.float32(2 * H + Tm1))
    attn_w = jax.random.uniform(ks[4], (1, 2 * H + Tm1), jnp.float32,
                                -k_attn, k_attn)
    attn_b = jax.random.uniform(ks[5], (1,), jnp.float32, -k_attn, k_attn)
    X = jax.random.normal(ks[6], (B, Tm1, I), jnp.float32)

    x_tilde, x_enc = encoder_forward(X, w_ih, w_hh, b_ih, b_hh, attn_w, attn_b)
    jax.block_until_ready((x_tilde, x_enc))

    ref_tilde, ref_enc = encoder_reference(
        X, w_ih, w_hh, b_ih, b_hh, attn_w, attn_b)
    assert x_tilde.shape == (B, Tm1, I) and x_enc.shape == (B, Tm1, H)
    assert jnp.allclose(x_tilde, ref_tilde, atol=1e-3, rtol=1e-3)
    assert jnp.allclose(x_enc, ref_enc, atol=1e-3, rtol=1e-3)
    print("KERNEL_OK")
</pallas_src>

<mosaic_0001>
module attributes {stable_mosaic.version = 11 : i64} {
  func.func @_encoder_kernel(%arg0: memref<8x128xf32, #tpu.memory_space<vmem>>, %arg1: memref<8x16xf32, #tpu.memory_space<vmem>>, %arg2: memref<16x128xf32, #tpu.memory_space<vmem>>, %arg3: memref<32x128xf32, #tpu.memory_space<vmem>>, %arg4: memref<1x128xf32, #tpu.memory_space<vmem>>, %arg5: memref<1x32xf32, #tpu.memory_space<vmem>>, %arg6: memref<1x32xf32, #tpu.memory_space<vmem>>, %arg7: memref<8x128xf32, #tpu.memory_space<vmem>>, %arg8: memref<8x256xf32, #tpu.memory_space<vmem>>) attributes {dimension_semantics = [], scalar_prefetch = 0 : i64, scratch_operands = 0 : i64, tpu.core_type = #tpu.core_type<tc>} {
    %c0 = arith.constant 0 : index
    %c0_0 = arith.constant 0 : index
    %0 = vector.load %arg0[%c0, %c0_0] : memref<8x128xf32, #tpu.memory_space<vmem>>, vector<8x128xf32>
    %c0_1 = arith.constant 0 : index
    %c0_2 = arith.constant 0 : index
    %1 = vector.load %arg1[%c0_1, %c0_2] : memref<8x16xf32, #tpu.memory_space<vmem>>, vector<8x16xf32>
    %c0_3 = arith.constant 0 : index
    %c0_4 = arith.constant 0 : index
    %2 = vector.load %arg5[%c0_3, %c0_4] : memref<1x32xf32, #tpu.memory_space<vmem>>, vector<1x32xf32>
    %3 = vector.shape_cast %2 : vector<1x32xf32> to vector<1x32xf32>
    %4 = vector.broadcast %3 : vector<1x32xf32> to vector<8x32xf32>
    %c0_5 = arith.constant 0 : index
    %c0_6 = arith.constant 0 : index
    %5 = vector.load %arg6[%c0_5, %c0_6] : memref<1x32xf32, #tpu.memory_space<vmem>>, vector<1x32xf32>
    %6 = vector.shape_cast %5 : vector<1x32xf32> to vector<1x32xf32>
    %7 = vector.broadcast %6 : vector<1x32xf32> to vector<8x32xf32>
    %c0_7 = arith.constant 0 : index
    %c0_8 = arith.constant 0 : index
    %8 = vector.load %arg2[%c0_7, %c0_8] : memref<16x128xf32, #tpu.memory_space<vmem>>, vector<16x128xf32>
    %c0_9 = arith.constant 0 : index
    %c0_10 = arith.constant 0 : index
    %9 = vector.load %arg3[%c0_9, %c0_10] : memref<32x128xf32, #tpu.memory_space<vmem>>, vector<32x128xf32>
    %c0_11 = arith.constant 0 : index
    %c0_12 = arith.constant 0 : index
    %10 = vector.load %arg4[%c0_11, %c0_12] : memref<1x128xf32, #tpu.memory_space<vmem>>, vector<1x128xf32>
    %11 = vector.extract_strided_slice %8 {offsets = [0, 0], sizes = [16, 32], strides = [1, 1]} : vector<16x128xf32> to vector<16x32xf32>
    %12 = vector.extract_strided_slice %8 {offsets = [0, 32], sizes = [16, 32], strides = [1, 1]} : vector<16x128xf32> to vector<16x32xf32>
    %13 = vector.extract_strided_slice %8 {offsets = [0, 64], sizes = [16, 32], strides = [1, 1]} : vector<16x128xf32> to vector<16x32xf32>
    %14 = vector.extract_strided_slice %8 {offsets = [0, 96], sizes = [16, 32], strides = [1, 1]} : vector<16x128xf32> to vector<16x32xf32>
    %15 = vector.extract_strided_slice %9 {offsets = [0, 0], sizes = [32, 32], strides = [1, 1]} : vector<32x128xf32> to vector<32x32xf32>
    %16 = vector.extract_strided_slice %9 {offsets = [0, 32], sizes = [32, 32], strides = [1, 1]} : vector<32x128xf32> to vector<32x32xf32>
    %17 = vector.extract_strided_slice %9 {offsets = [0, 64], sizes = [32, 32], strides = [1, 1]} : vector<32x128xf32> to vector<32x32xf32>
    %18 = vector.extract_strided_slice %9 {offsets = [0, 96], sizes = [32, 32], strides = [1, 1]} : vector<32x128xf32> to vector<32x32xf32>
    %19 = vector.extract_strided_slice %10 {offsets = [0, 0], sizes = [1, 32], strides = [1, 1]} : vector<1x128xf32> to vector<1x32xf32>
    %20 = vector.shape_cast %19 : vector<1x32xf32> to vector<1x32xf32>
    %21 = vector.broadcast %20 : vector<1x32xf32> to vector<8x32xf32>
    %22 = vector.extract_strided_slice %10 {offsets = [0, 32], sizes = [1, 32], strides = [1, 1]} : vector<1x128xf32> to vector<1x32xf32>
    %23 = vector.shape_cast %22 : vector<1x32xf32> to vector<1x32xf32>
    %24 = vector.broadcast %23 : vector<1x32xf32> to vector<8x32xf32>
    %25 = vector.extract_strided_slice %10 {offsets = [0, 64], sizes = [1, 32], strides = [1, 1]} : vector<1x128xf32> to vector<1x32xf32>
    %26 = vector.shape_cast %25 : vector<1x32xf32> to vector<1x32xf32>
    %27 = vector.broadcast %26 : vector<1x32xf32> to vector<8x32xf32>
    %28 = vector.extract_strided_slice %10 {offsets = [0, 96], sizes = [1, 32], strides = [1, 1]} : vector<1x128xf32> to vector<1x32xf32>
    %29 = vector.shape_cast %28 : vector<1x32xf32> to vector<1x32xf32>
    %30 = vector.broadcast %29 : vector<1x32xf32> to vector<8x32xf32>
    %cst = arith.constant 0.000000e+00 : f32
    %31 = vector.broadcast %cst : f32 to vector<8x32xf32>
    %cst_13 = arith.constant 0.000000e+00 : f32
    %32 = vector.broadcast %cst_13 : f32 to vector<8x32xf32>
    %33 = vector.extract_strided_slice %0 {offsets = [0, 0], sizes = [8, 16], strides = [1, 1]} : vector<8x128xf32> to vector<8x16xf32>
    %34 = arith.mulf %31, %4 : vector<8x32xf32>
    %35 = arith.mulf %32, %7 : vector<8x32xf32>
    %36 = arith.addf %34, %35 : vector<8x32xf32>
    %cst_14 = arith.constant dense<0.000000e+00> : vector<8xf32>
    %37 = vector.multi_reduction <add>, %36, %cst_14 [1] : vector<8x32xf32> to vector<8xf32>
    %38 = vector.shape_cast %37 : vector<8xf32> to vector<8x1xf32>
    %39 = vector.broadcast %38 : vector<8x1xf32> to vector<8x16xf32>
    %40 = arith.addf %1, %39 : vector<8x16xf32>
    %cst_15 = arith.constant dense<0xFF800000> : vector<8xf32>
    %41 = vector.multi_reduction <maximumf>, %40, %cst_15 [1] : vector<8x16xf32> to vector<8xf32>
    %42 = vector.shape_cast %41 : vector<8xf32> to vector<8x1xf32>
    %43 = vector.broadcast %42 : vector<8x1xf32> to vector<8x16xf32>
    %44 = arith.subf %40, %43 : vector<8x16xf32>
    %45 = math.exp %44 : vector<8x16xf32>
    %46 = arith.mulf %45, %33 : vector<8x16xf32>
    %cst_16 = arith.constant dense<0.000000e+00> : vector<8xf32>
    %47 = vector.multi_reduction <add>, %45, %cst_16 [1] : vector<8x16xf32> to vector<8xf32>
    %48 = vector.shape_cast %47 : vector<8xf32> to vector<8x1xf32>
    %49 = tpu.reciprocal %48 {approx = true} : vector<8x1xf32> -> vector<8x1xf32>
    %50 = arith.mulf %48, %49 : vector<8x1xf32>
    %cst_17 = arith.constant 2.000000e+00 : f32
    %51 = vector.broadcast %cst_17 : f32 to vector<8x1xf32>
    %52 = arith.subf %51, %50 : vector<8x1xf32>
    %53 = arith.mulf %49, %52 : vector<8x1xf32>
    %54 = vector.broadcast %53 : vector<8x1xf32> to vector<8x16xf32>
    %55 = arith.mulf %46, %54 : vector<8x16xf32>
    %cst_18 = arith.constant dense<0.000000e+00> : vector<8x32xf32>
    %56 = tpu.matmul %55, %11, %cst_18 {dimension_numbers = #tpu.dot_dimension_numbers<[1], [0], [0], [1], [0, 0, 1, 1], [], []>} : vector<8x16xf32>, vector<16x32xf32>, vector<8x32xf32> -> vector<8x32xf32>
    %cst_19 = arith.constant dense<0.000000e+00> : vector<8x32xf32>
    %57 = tpu.matmul %31, %15, %cst_19 {dimension_numbers = #tpu.dot_dimension_numbers<[1], [0], [0], [1], [0, 0, 1, 1], [], []>} : vector<8x32xf32>, vector<32x32xf32>, vector<8x32xf32> -> vector<8x32xf32>
    %58 = arith.addf %56, %57 : vector<8x32xf32>
    %59 = arith.addf %58, %21 : vector<8x32xf32>
    %60 = arith.negf %59 : vector<8x32xf32>
    %61 = math.exp %60 : vector<8x32xf32>
    %cst_20 = arith.constant 1.000000e+00 : f32
    %62 = vector.broadcast %cst_20 : f32 to vector<8x32xf32>
    %63 = arith.addf %62, %61 : vector<8x32xf32>
    %64 = arith.divf %62, %63 : vector<8x32xf32>
    %cst_21 = arith.constant dense<0.000000e+00> : vector<8x32xf32>
    %65 = tpu.matmul %55, %12, %cst_21 {dimension_numbers = #tpu.dot_dimension_numbers<[1], [0], [0], [1], [0, 0, 1, 1], [], []>} : vector<8x16xf32>, vector<16x32xf32>, vector<8x32xf32> -> vector<8x32xf32>
    %cst_22 = arith.constant dense<0.000000e+00> : vector<8x32xf32>
    %66 = tpu.matmul %31, %16, %cst_22 {dimension_numbers = #tpu.dot_dimension_numbers<[1], [0], [0], [1], [0, 0, 1, 1], [], []>} : vector<8x32xf32>, vector<32x32xf32>, vector<8x32xf32> -> vector<8x32xf32>
    %67 = arith.addf %65, %66 : vector<8x32xf32>
    %68 = arith.addf %67, %24 : vector<8x32xf32>
    %69 = arith.negf %68 : vector<8x32xf32>
    %70 = math.exp %69 : vector<8x32xf32>
    %cst_23 = arith.constant 1.000000e+00 : f32
    %71 = vector.broadcast %cst_23 : f32 to vector<8x32xf32>
    %72 = arith.addf %71, %70 : vector<8x32xf32>
    %73 = arith.divf %71, %72 : vector<8x32xf32>
    %cst_24 = arith.constant dense<0.000000e+00> : vector<8x32xf32>
    %74 = tpu.matmul %55, %13, %cst_24 {dimension_numbers = #tpu.dot_dimension_numbers<[1], [0], [0], [1], [0, 0, 1, 1], [], []>} : vector<8x16xf32>, vector<16x32xf32>, vector<8x32xf32> -> vector<8x32xf32>
    %cst_25 = arith.constant dense<0.000000e+00> : vector<8x32xf32>
    %75 = tpu.matmul %31, %17, %cst_25 {dimension_numbers = #tpu.dot_dimension_numbers<[1], [0], [0], [1], [0, 0, 1, 1], [], []>} : vector<8x32xf32>, vector<32x32xf32>, vector<8x32xf32> -> vector<8x32xf32>
    %76 = arith.addf %74, %75 : vector<8x32xf32>
    %77 = arith.addf %76, %27 : vector<8x32xf32>
    %78 = math.tanh %77 : vector<8x32xf32>
    %cst_26 = arith.constant dense<0.000000e+00> : vector<8x32xf32>
    %79 = tpu.matmul %55, %14, %cst_26 {dimension_numbers = #tpu.dot_dimension_numbers<[1], [0], [0], [1], [0, 0, 1, 1], [], []>} : vector<8x16xf32>, vector<16x32xf32>, vector<8x32xf32> -> vector<8x32xf32>
    %cst_27 = arith.constant dense<0.000000e+00> : vector<8x32xf32>
    %80 = tpu.matmul %31, %18, %cst_27 {dimension_numbers = #tpu.dot_dimension_numbers<[1], [0], [0], [1], [0, 0, 1, 1], [], []>} : vector<8x32xf32>, vector<32x32xf32>, vector<8x32xf32> -> vector<8x32xf32>
    %81 = arith.addf %79, %80 : vector<8x32xf32>
    %82 = arith.addf %81, %30 : vector<8x32xf32>
    %83 = arith.negf %82 : vector<8x32xf32>
    %84 = math.exp %83 : vector<8x32xf32>
    %cst_28 = arith.constant 1.000000e+00 : f32
    %85 = vector.broadcast %cst_28 : f32 to vector<8x32xf32>
    %86 = arith.addf %85, %84 : vector<8x32xf32>
    %87 = arith.divf %85, %86 : vector<8x32xf32>
    %88 = arith.mulf %73, %32 : vector<8x32xf32>
    %89 = arith.mulf %64, %78 : vector<8x32xf32>
    %90 = arith.addf %88, %89 : vector<8x32xf32>
    %91 = math.tanh %90 : vector<8x32xf32>
    %92 = arith.mulf %87, %91 : vector<8x32xf32>
    %c0_29 = arith.constant 0 : index
    %c0_30 = arith.constant 0 : index
    %93 = vector.load %arg7[%c0_29, %c0_30] : memref<8x128xf32, #tpu.memory_space<vmem>>, vector<8x16xf32>
    tpu.vector_store %arg7[%c0_29, %c0_30], %55 {strides = array<i32>} : memref<8x128xf32, #tpu.memory_space<vmem>>, vector<8x16xf32>,
    %c0_31 = arith.constant 0 : index
    %c0_32 = arith.constant 0 : index
    %94 = vector.load %arg8[%c0_31, %c0_32] : memref<8x256xf32, #tpu.memory_space<vmem>>, vector<8x32xf32>
    tpu.vector_store %arg8[%c0_31, %c0_32], %92 {strides = array<i32>} : memref<8x256xf32, #tpu.memory_space<vmem>>, vector<8x32xf32>,
    %95 = vector.extract_strided_slice %0 {offsets = [0, 16], sizes = [8, 16], strides = [1, 1]} : vector<8x128xf32> to vector<8x16xf32>
    %96 = arith.mulf %92, %4 : vector<8x32xf32>
    %97 = arith.mulf %90, %7 : vector<8x32xf32>
    %98 = arith.addf %96, %97 : vector<8x32xf32>
    %cst_33 = arith.constant dense<0.000000e+00> : vector<8xf32>
    %99 = vector.multi_reduction <add>, %98, %cst_33 [1] : vector<8x32xf32> to vector<8xf32>
    %100 = vector.shape_cast %99 : vector<8xf32> to vector<8x1xf32>
    %101 = vector.broadcast %100 : vector<8x1xf32> to vector<8x16xf32>
    %102 = arith.addf %1, %101 : vector<8x16xf32>
    %cst_34 = arith.constant dense<0xFF800000> : vector<8xf32>
    %103 = vector.multi_reduction <maximumf>, %102, %cst_34 [1] : vector<8x16xf32> to vector<8xf32>
    %104 = vector.shape_cast %103 : vector<8xf32> to vector<8x1xf32>
    %105 = vector.broadcast %104 : vector<8x1xf32> to vector<8x16xf32>
    %106 = arith.subf %102, %105 : vector<8x16xf32>
    %107 = math.exp %106 : vector<8x16xf32>
    %108 = arith.mulf %107, %95 : vector<8x16xf32>
    %cst_35 = arith.constant dense<0.000000e+00> : vector<8xf32>
    %109 = vector.multi_reduction <add>, %107, %cst_35 [1] : vector<8x16xf32> to vector<8xf32>
    %110 = vector.shape_cast %109 : vector<8xf32> to vector<8x1xf32>
    %111 = tpu.reciprocal %110 {approx = true} : vector<8x1xf32> -> vector<8x1xf32>
    %112 = arith.mulf %110, %111 : vector<8x1xf32>
    %cst_36 = arith.constant 2.000000e+00 : f32
    %113 = vector.broadcast %cst_36 : f32 to vector<8x1xf32>
    %114 = arith.subf %113, %112 : vector<8x1xf32>
    %115 = arith.mulf %111, %114 : vector<8x1xf32>
    %116 = vector.broadcast %115 : vector<8x1xf32> to vector<8x16xf32>
    %117 = arith.mulf %108, %116 : vector<8x16xf32>
    %cst_37 = arith.constant dense<0.000000e+00> : vector<8x32xf32>
    %118 = tpu.matmul %117, %11, %cst_37 {dimension_numbers = #tpu.dot_dimension_numbers<[1], [0], [0], [1], [0, 0, 1, 1], [], []>} : vector<8x16xf32>, vector<16x32xf32>, vector<8x32xf32> -> vector<8x32xf32>
    %cst_38 = arith.constant dense<0.000000e+00> : vector<8x32xf32>
    %119 = tpu.matmul %92, %15, %cst_38 {dimension_numbers = #tpu.dot_dimension_numbers<[1], [0], [0], [1], [0, 0, 1, 1], [], []>} : vector<8x32xf32>, vector<32x32xf32>, vector<8x32xf32> -> vector<8x32xf32>
    %120 = arith.addf %118, %119 : vector<8x32xf32>
    %121 = arith.addf %120, %21 : vector<8x32xf32>
    %122 = arith.negf %121 : vector<8x32xf32>
    %123 = math.exp %122 : vector<8x32xf32>
    %cst_39 = arith.constant 1.000000e+00 : f32
    %124 = vector.broadcast %cst_39 : f32 to vector<8x32xf32>
    %125 = arith.addf %124, %123 : vector<8x32xf32>
    %126 = arith.divf %124, %125 : vector<8x32xf32>
    %cst_40 = arith.constant dense<0.000000e+00> : vector<8x32xf32>
    %127 = tpu.matmul %117, %12, %cst_40 {dimension_numbers = #tpu.dot_dimension_numbers<[1], [0], [0], [1], [0, 0, 1, 1], [], []>} : vector<8x16xf32>, vector<16x32xf32>, vector<8x32xf32> -> vector<8x32xf32>
    %cst_41 = arith.constant dense<0.000000e+00> : vector<8x32xf32>
    %128 = tpu.matmul %92, %16, %cst_41 {dimension_numbers = #tpu.dot_dimension_numbers<[1], [0], [0], [1], [0, 0, 1, 1], [], []>} : vector<8x32xf32>, vector<32x32xf32>, vector<8x32xf32> -> vector<8x32xf32>
    %129 = arith.addf %127, %128 : vector<8x32xf32>
    %130 = arith.addf %129, %24 : vector<8x32xf32>
    %131 = arith.negf %130 : vector<8x32xf32>
    %132 = math.exp %131 : vector<8x32xf32>
    %cst_42 = arith.constant 1.000000e+00 : f32
    %133 = vector.broadcast %cst_42 : f32 to vector<8x32xf32>
    %134 = arith.addf %133, %132 : vector<8x32xf32>
    %135 = arith.divf %133, %134 : vector<8x32xf32>
    %cst_43 = arith.constant dense<0.000000e+00> : vector<8x32xf32>
    %136 = tpu.matmul %117, %13, %cst_43 {dimension_numbers = #tpu.dot_dimension_numbers<[1], [0], [0], [1], [0, 0, 1, 1], [], []>} : vector<8x16xf32>, vector<16x32xf32>, vector<8x32xf32> -> vector<8x32xf32>
    %cst_44 = arith.constant dense<0.000000e+00> : vector<8x32xf32>
    %137 = tpu.matmul %92, %17, %cst_44 {dimension_numbers = #tpu.dot_dimension_numbers<[1], [0], [0], [1], [0, 0, 1, 1], [], []>} : vector<8x32xf32>, vector<32x32xf32>, vector<8x32xf32> -> vector<8x32xf32>
    %138 = arith.addf %136, %137 : vector<8x32xf32>
    %139 = arith.addf %138, %27 : vector<8x32xf32>
    %140 = math.tanh %139 : vector<8x32xf32>
    %cst_45 = arith.constant dense<0.000000e+00> : vector<8x32xf32>
    %141 = tpu.matmul %117, %14, %cst_45 {dimension_numbers = #tpu.dot_dimension_numbers<[1], [0], [0], [1], [0, 0, 1, 1], [], []>} : vector<8x16xf32>, vector<16x32xf32>, vector<8x32xf32> -> vector<8x32xf32>
    %cst_46 = arith.constant dense<0.000000e+00> : vector<8x32xf32>
    %142 = tpu.matmul %92, %18, %cst_46 {dimension_numbers = #tpu.dot_dimension_numbers<[1], [0], [0], [1], [0, 0, 1, 1], [], []>} : vector<8x32xf32>, vector<32x32xf32>, vector<8x32xf32> -> vector<8x32xf32>
    %143 = arith.addf %141, %142 : vector<8x32xf32>
    %144 = arith.addf %143, %30 : vector<8x32xf32>
    %145 = arith.negf %144 : vector<8x32xf32>
    %146 = math.exp %145 : vector<8x32xf32>
    %cst_47 = arith.constant 1.000000e+00 : f32
    %147 = vector.broadcast %cst_47 : f32 to vector<8x32xf32>
    %148 = arith.addf %147, %146 : vector<8x32xf32>
    %149 = arith.divf %147, %148 : vector<8x32xf32>
    %150 = arith.mulf %135, %90 : vector<8x32xf32>
    %151 = arith.mulf %126, %140 : vector<8x32xf32>
    %152 = arith.addf %150, %151 : vector<8x32xf32>
    %153 = math.tanh %152 : vector<8x32xf32>
    %154 = arith.mulf %149, %153 : vector<8x32xf32>
    %c0_48 = arith.constant 0 : index
    %c16 = arith.constant 16 : index
    %155 = vector.load %arg7[%c0_48, %c16] : memref<8x128xf32, #tpu.memory_space<vmem>>, vector<8x16xf32>
    tpu.vector_store %arg7[%c0_48, %c16], %117 {strides = array<i32>} : memref<8x128xf32, #tpu.memory_space<vmem>>, vector<8x16xf32>,
    %c0_49 = arith.constant 0 : index
    %c32 = arith.constant 32 : index
    %156 = vector.load %arg8[%c0_49, %c32] : memref<8x256xf32, #tpu.memory_space<vmem>>, vector<8x32xf32>
    tpu.vector_store %arg8[%c0_49, %c32], %154 {strides = array<i32>} : memref<8x256xf32, #tpu.memory_space<vmem>>, vector<8x32xf32>,
    %157 = vector.extract_strided_slice %0 {offsets = [0, 32], sizes = [8, 16], strides = [1, 1]} : vector<8x128xf32> to vector<8x16xf32>
    %158 = arith.mulf %154, %4 : vector<8x32xf32>
    %159 = arith.mulf %152, %7 : vector<8x32xf32>
    %160 = arith.addf %158, %159 : vector<8x32xf32>
    %cst_50 = arith.constant dense<0.000000e+00> : vector<8xf32>
    %161 = vector.multi_reduction <add>, %160, %cst_50 [1] : vector<8x32xf32> to vector<8xf32>
    %162 = vector.shape_cast %161 : vector<8xf32> to vector<8x1xf32>
    %163 = vector.broadcast %162 : vector<8x1xf32> to vector<8x16xf32>
    %164 = arith.addf %1, %163 : vector<8x16xf32>
    %cst_51 = arith.constant dense<0xFF800000> : vector<8xf32>
    %165 = vector.multi_reduction <maximumf>, %164, %cst_51 [1] : vector<8x16xf32> to vector<8xf32>
    %166 = vector.shape_cast %165 : vector<8xf32> to vector<8x1xf32>
    %167 = vector.broadcast %166 : vector<8x1xf32> to vector<8x16xf32>
    %168 = arith.subf %164, %167 : vector<8x16xf32>
    %169 = math.exp %168 : vector<8x16xf32>
    %170 = arith.mulf %169, %157 : vector<8x16xf32>
    %cst_52 = arith.constant dense<0.000000e+00> : vector<8xf32>
    %171 = vector.multi_reduction <add>, %169, %cst_52 [1] : vector<8x16xf32> to vector<8xf32>
    %172 = vector.shape_cast %171 : vector<8xf32> to vector<8x1xf32>
    %173 = tpu.reciprocal %172 {approx = true} : vector<8x1xf32> -> vector<8x1xf32>
    %174 = arith.mulf %172, %173 : vector<8x1xf32>
    %cst_53 = arith.constant 2.000000e+00 : f32
    %175 = vector.broadcast %cst_53 : f32 to vector<8x1xf32>
    %176 = arith.subf %175, %174 : vector<8x1xf32>
    %177 = arith.mulf %173, %176 : vector<8x1xf32>
    %178 = vector.broadcast %177 : vector<8x1xf32> to vector<8x16xf32>
    %179 = arith.mulf %170, %178 : vector<8x16xf32>
    %cst_54 = arith.constant dense<0.000000e+00> : vector<8x32xf32>
    %180 = tpu.matmul %179, %11, %cst_54 {dimension_numbers = #tpu.dot_dimension_numbers<[1], [0], [0], [1], [0, 0, 1, 1], [], []>} : vector<8x16xf32>, vector<16x32xf32>, vector<8x32xf32> -> vector<8x32xf32>
    %cst_55 = arith.constant dense<0.000000e+00> : vector<8x32xf32>
    %181 = tpu.matmul %154, %15, %cst_55 {dimension_numbers = #tpu.dot_dimension_numbers<[1], [0], [0], [1], [0, 0, 1, 1], [], []>} : vector<8x32xf32>, vector<32x32xf32>, vector<8x32xf32> -> vector<8x32xf32>
    %182 = arith.addf %180, %181 : vector<8x32xf32>
    %183 = arith.addf %182, %21 : vector<8x32xf32>
    %184 = arith.negf %183 : vector<8x32xf32>
    %185 = math.exp %184 : vector<8x32xf32>
    %cst_56 = arith.constant 1.000000e+00 : f32
    %186 = vector.broadcast %cst_56 : f32 to vector<8x32xf32>
    %187 = arith.addf %186, %185 : vector<8x32xf32>
    %188 = arith.divf %186, %187 : vector<8x32xf32>
    %cst_57 = arith.constant dense<0.000000e+00> : vector<8x32xf32>
    %189 = tpu.matmul %179, %12, %cst_57 {dimension_numbers = #tpu.dot_dimension_numbers<[1], [0], [0], [1], [0, 0, 1, 1], [], []>} : vector<8x16xf32>, vector<16x32xf32>, vector<8x32xf32> -> vector<8x32xf32>
    %cst_58 = arith.constant dense<0.000000e+00> : vector<8x32xf32>
    %190 = tpu.matmul %154, %16, %cst_58 {dimension_numbers = #tpu.dot_dimension_numbers<[1], [0], [0], [1], [0, 0, 1, 1], [], []>} : vector<8x32xf32>, vector<32x32xf32>, vector<8x32xf32> -> vector<8x32xf32>
    %191 = arith.addf %189, %190 : vector<8x32xf32>
    %192 = arith.addf %191, %24 : vector<8x32xf32>
    %193 = arith.negf %192 : vector<8x32xf32>
    %194 = math.exp %193 : vector<8x32xf32>
    %cst_59 = arith.constant 1.000000e+00 : f32
    %195 = vector.broadcast %cst_59 : f32 to vector<8x32xf32>
    %196 = arith.addf %195, %194 : vector<8x32xf32>
    %197 = arith.divf %195, %196 : vector<8x32xf32>
    %cst_60 = arith.constant dense<0.000000e+00> : vector<8x32xf32>
    %198 = tpu.matmul %179, %13, %cst_60 {dimension_numbers = #tpu.dot_dimension_numbers<[1], [0], [0], [1], [0, 0, 1, 1], [], []>} : vector<8x16xf32>, vector<16x32xf32>, vector<8x32xf32> -> vector<8x32xf32>
    %cst_61 = arith.constant dense<0.000000e+00> : vector<8x32xf32>
    %199 = tpu.matmul %154, %17, %cst_61 {dimension_numbers = #tpu.dot_dimension_numbers<[1], [0], [0], [1], [0, 0, 1, 1], [], []>} : vector<8x32xf32>, vector<32x32xf32>, vector<8x32xf32> -> vector<8x32xf32>
    %200 = arith.addf %198, %199 : vector<8x32xf32>
    %201 = arith.addf %200, %27 : vector<8x32xf32>
    %202 = math.tanh %201 : vector<8x32xf32>
    %cst_62 = arith.constant dense<0.000000e+00> : vector<8x32xf32>
    %203 = tpu.matmul %179, %14, %cst_62 {dimension_numbers = #tpu.dot_dimension_numbers<[1], [0], [0], [1], [0, 0, 1, 1], [], []>} : vector<8x16xf32>, vector<16x32xf32>, vector<8x32xf32> -> vector<8x32xf32>
    %cst_63 = arith.constant dense<0.000000e+00> : vector<8x32xf32>
    %204 = tpu.matmul %154, %18, %cst_63 {dimension_numbers = #tpu.dot_dimension_numbers<[1], [0], [0], [1], [0, 0, 1, 1], [], []>} : vector<8x32xf32>, vector<32x32xf32>, vector<8x32xf32> -> vector<8x32xf32>
    %205 = arith.addf %203, %204 : vector<8x32xf32>
    %206 = arith.addf %205, %30 : vector<8x32xf32>
    %207 = arith.negf %206 : vector<8x32xf32>
    %208 = math.exp %207 : vector<8x32xf32>
    %cst_64 = arith.constant 1.000000e+00 : f32
    %209 = vector.broadcast %cst_64 : f32 to vector<8x32xf32>
    %210 = arith.addf %209, %208 : vector<8x32xf32>
    %211 = arith.divf %209, %210 : vector<8x32xf32>
    %212 = arith.mulf %197, %152 : vector<8x32xf32>
    %213 = arith.mulf %188, %202 : vector<8x32xf32>
    %214 = arith.addf %212, %213 : vector<8x32xf32>
    %215 = math.tanh %214 : vector<8x32xf32>
    %216 = arith.mulf %211, %215 : vector<8x32xf32>
    %c0_65 = arith.constant 0 : index
    %c32_66 = arith.constant 32 : index
    %217 = vector.load %arg7[%c0_65, %c32_66] : memref<8x128xf32, #tpu.memory_space<vmem>>, vector<8x16xf32>
    tpu.vector_store %arg7[%c0_65, %c32_66], %179 {strides = array<i32>} : memref<8x128xf32, #tpu.memory_space<vmem>>, vector<8x16xf32>,
    %c0_67 = arith.constant 0 : index
    %c64 = arith.constant 64 : index
    %218 = vector.load %arg8[%c0_67, %c64] : memref<8x256xf32, #tpu.memory_space<vmem>>, vector<8x32xf32>
    tpu.vector_store %arg8[%c0_67, %c64], %216 {strides = array<i32>} : memref<8x256xf32, #tpu.memory_space<vmem>>, vector<8x32xf32>,
    %219 = vector.extract_strided_slice %0 {offsets = [0, 48], sizes = [8, 16], strides = [1, 1]} : vector<8x128xf32> to vector<8x16xf32>
    %220 = arith.mulf %216, %4 : vector<8x32xf32>
    %221 = arith.mulf %214, %7 : vector<8x32xf32>
    %222 = arith.addf %220, %221 : vector<8x32xf32>
    %cst_68 = arith.constant dense<0.000000e+00> : vector<8xf32>
    %223 = vector.multi_reduction <add>, %222, %cst_68 [1] : vector<8x32xf32> to vector<8xf32>
    %224 = vector.shape_cast %223 : vector<8xf32> to vector<8x1xf32>
    %225 = vector.broadcast %224 : vector<8x1xf32> to vector<8x16xf32>
    %226 = arith.addf %1, %225 : vector<8x16xf32>
    %cst_69 = arith.constant dense<0xFF800000> : vector<8xf32>
    %227 = vector.multi_reduction <maximumf>, %226, %cst_69 [1] : vector<8x16xf32> to vector<8xf32>
    %228 = vector.shape_cast %227 : vector<8xf32> to vector<8x1xf32>
    %229 = vector.broadcast %228 : vector<8x1xf32> to vector<8x16xf32>
    %230 = arith.subf %226, %229 : vector<8x16xf32>
    %231 = math.exp %230 : vector<8x16xf32>
    %232 = arith.mulf %231, %219 : vector<8x16xf32>
    %cst_70 = arith.constant dense<0.000000e+00> : vector<8xf32>
    %233 = vector.multi_reduction <add>, %231, %cst_70 [1] : vector<8x16xf32> to vector<8xf32>
    %234 = vector.shape_cast %233 : vector<8xf32> to vector<8x1xf32>
    %235 = tpu.reciprocal %234 {approx = true} : vector<8x1xf32> -> vector<8x1xf32>
    %236 = arith.mulf %234, %235 : vector<8x1xf32>
    %cst_71 = arith.constant 2.000000e+00 : f32
    %237 = vector.broadcast %cst_71 : f32 to vector<8x1xf32>
    %238 = arith.subf %237, %236 : vector<8x1xf32>
    %239 = arith.mulf %235, %238 : vector<8x1xf32>
    %240 = vector.broadcast %239 : vector<8x1xf32> to vector<8x16xf32>
    %241 = arith.mulf %232, %240 : vector<8x16xf32>
    %cst_72 = arith.constant dense<0.000000e+00> : vector<8x32xf32>
    %242 = tpu.matmul %241, %11, %cst_72 {dimension_numbers = #tpu.dot_dimension_numbers<[1], [0], [0], [1], [0, 0, 1, 1], [], []>} : vector<8x16xf32>, vector<16x32xf32>, vector<8x32xf32> -> vector<8x32xf32>
    %cst_73 = arith.constant dense<0.000000e+00> : vector<8x32xf32>
    %243 = tpu.matmul %216, %15, %cst_73 {dimension_numbers = #tpu.dot_dimension_numbers<[1], [0], [0], [1], [0, 0, 1, 1], [], []>} : vector<8x32xf32>, vector<32x32xf32>, vector<8x32xf32> -> vector<8x32xf32>
    %244 = arith.addf %242, %243 : vector<8x32xf32>
    %245 = arith.addf %244, %21 : vector<8x32xf32>
    %246 = arith.negf %245 : vector<8x32xf32>
    %247 = math.exp %246 : vector<8x32xf32>
    %cst_74 = arith.constant 1.000000e+00 : f32
    %248 = vector.broadcast %cst_74 : f32 to vector<8x32xf32>
    %249 = arith.addf %248, %247 : vector<8x32xf32>
    %250 = arith.divf %248, %249 : vector<8x32xf32>
    %cst_75 = arith.constant dense<0.000000e+00> : vector<8x32xf32>
    %251 = tpu.matmul %241, %12, %cst_75 {dimension_numbers = #tpu.dot_dimension_numbers<[1], [0], [0], [1], [0, 0, 1, 1], [], []>} : vector<8x16xf32>, vector<16x32xf32>, vector<8x32xf32> -> vector<8x32xf32>
    %cst_76 = arith.constant dense<0.000000e+00> : vector<8x32xf32>
    %252 = tpu.matmul %216, %16, %cst_76 {dimension_numbers = #tpu.dot_dimension_numbers<[1], [0], [0], [1], [0, 0, 1, 1], [], []>} : vector<8x32xf32>, vector<32x32xf32>, vector<8x32xf32> -> vector<8x32xf32>
    %253 = arith.addf %251, %252 : vector<8x32xf32>
    %254 = arith.addf %253, %24 : vector<8x32xf32>
    %255 = arith.negf %254 : vector<8x32xf32>
    %256 = math.exp %255 : vector<8x32xf32>
    %cst_77 = arith.constant 1.000000e+00 : f32
    %257 = vector.broadcast %cst_77 : f32 to vector<8x32xf32>
    %258 = arith.addf %257, %256 : vector<8x32xf32>
    %259 = arith.divf %257, %258 : vector<8x32xf32>
    %cst_78 = arith.constant dense<0.000000e+00> : vector<8x32xf32>
    %260 = tpu.matmul %241, %13, %cst_78 {dimension_numbers = #tpu.dot_dimension_numbers<[1], [0], [0], [1], [0, 0, 1, 1], [], []>} : vector<8x16xf32>, vector<16x32xf32>, vector<8x32xf32> -> vector<8x32xf32>
    %cst_79 = arith.constant dense<0.000000e+00> : vector<8x32xf32>
    %261 = tpu.matmul %216, %17, %cst_79 {dimension_numbers = #tpu.dot_dimension_numbers<[1], [0], [0], [1], [0, 0, 1, 1], [], []>} : vector<8x32xf32>, vector<32x32xf32>, vector<8x32xf32> -> vector<8x32xf32>
    %262 = arith.addf %260, %261 : vector<8x32xf32>
    %263 = arith.addf %262, %27 : vector<8x32xf32>
    %264 = math.tanh %263 : vector<8x32xf32>
    %cst_80 = arith.constant dense<0.000000e+00> : vector<8x32xf32>
    %265 = tpu.matmul %241, %14, %cst_80 {dimension_numbers = #tpu.dot_dimension_numbers<[1], [0], [0], [1], [0, 0, 1, 1], [], []>} : vector<8x16xf32>, vector<16x32xf32>, vector<8x32xf32> -> vector<8x32xf32>
    %cst_81 = arith.constant dense<0.000000e+00> : vector<8x32xf32>
    %266 = tpu.matmul %216, %18, %cst_81 {dimension_numbers = #tpu.dot_dimension_numbers<[1], [0], [0], [1], [0, 0, 1, 1], [], []>} : vector<8x32xf32>, vector<32x32xf32>, vector<8x32xf32> -> vector<8x32xf32>
    %267 = arith.addf %265, %266 : vector<8x32xf32>
    %268 = arith.addf %267, %30 : vector<8x32xf32>
    %269 = arith.negf %268 : vector<8x32xf32>
    %270 = math.exp %269 : vector<8x32xf32>
    %cst_82 = arith.constant 1.000000e+00 : f32
    %271 = vector.broadcast %cst_82 : f32 to vector<8x32xf32>
    %272 = arith.addf %271, %270 : vector<8x32xf32>
    %273 = arith.divf %271, %272 : vector<8x32xf32>
    %274 = arith.mulf %259, %214 : vector<8x32xf32>
    %275 = arith.mulf %250, %264 : vector<8x32xf32>
    %276 = arith.addf %274, %275 : vector<8x32xf32>
    %277 = math.tanh %276 : vector<8x32xf32>
    %278 = arith.mulf %273, %277 : vector<8x32xf32>
    %c0_83 = arith.constant 0 : index
    %c48 = arith.constant 48 : index
    %279 = vector.load %arg7[%c0_83, %c48] : memref<8x128xf32, #tpu.memory_space<vmem>>, vector<8x16xf32>
    tpu.vector_store %arg7[%c0_83, %c48], %241 {strides = array<i32>} : memref<8x128xf32, #tpu.memory_space<vmem>>, vector<8x16xf32>,
    %c0_84 = arith.constant 0 : index
    %c96 = arith.constant 96 : index
    %280 = vector.load %arg8[%c0_84, %c96] : memref<8x256xf32, #tpu.memory_space<vmem>>, vector<8x32xf32>
    tpu.vector_store %arg8[%c0_84, %c96], %278 {strides = array<i32>} : memref<8x256xf32, #tpu.memory_space<vmem>>, vector<8x32xf32>,
    %281 = vector.extract_strided_slice %0 {offsets = [0, 64], sizes = [8, 16], strides = [1, 1]} : vector<8x128xf32> to vector<8x16xf32>
    %282 = arith.mulf %278, %4 : vector<8x32xf32>
    %283 = arith.mulf %276, %7 : vector<8x32xf32>
    %284 = arith.addf %282, %283 : vector<8x32xf32>
    %cst_85 = arith.constant dense<0.000000e+00> : vector<8xf32>
    %285 = vector.multi_reduction <add>, %284, %cst_85 [1] : vector<8x32xf32> to vector<8xf32>
    %286 = vector.shape_cast %285 : vector<8xf32> to vector<8x1xf32>
    %287 = vector.broadcast %286 : vector<8x1xf32> to vector<8x16xf32>
    %288 = arith.addf %1, %287 : vector<8x16xf32>
    %cst_86 = arith.constant dense<0xFF800000> : vector<8xf32>
    %289 = vector.multi_reduction <maximumf>, %288, %cst_86 [1] : vector<8x16xf32> to vector<8xf32>
    %290 = vector.shape_cast %289 : vector<8xf32> to vector<8x1xf32>
    %291 = vector.broadcast %290 : vector<8x1xf32> to vector<8x16xf32>
    %292 = arith.subf %288, %291 : vector<8x16xf32>
    %293 = math.exp %292 : vector<8x16xf32>
    %294 = arith.mulf %293, %281 : vector<8x16xf32>
    %cst_87 = arith.constant dense<0.000000e+00> : vector<8xf32>
    %295 = vector.multi_reduction <add>, %293, %cst_87 [1] : vector<8x16xf32> to vector<8xf32>
    %296 = vector.shape_cast %295 : vector<8xf32> to vector<8x1xf32>
    %297 = tpu.reciprocal %296 {approx = true} : vector<8x1xf32> -> vector<8x1xf32>
    %298 = arith.mulf %296, %297 : vector<8x1xf32>
    %cst_88 = arith.constant 2.000000e+00 : f32
    %299 = vector.broadcast %cst_88 : f32 to vector<8x1xf32>
    %300 = arith.subf %299, %298 : vector<8x1xf32>
    %301 = arith.mulf %297, %300 : vector<8x1xf32>
    %302 = vector.broadcast %301 : vector<8x1xf32> to vector<8x16xf32>
    %303 = arith.mulf %294, %302 : vector<8x16xf32>
    %cst_89 = arith.constant dense<0.000000e+00> : vector<8x32xf32>
    %304 = tpu.matmul %303, %11, %cst_89 {dimension_numbers = #tpu.dot_dimension_numbers<[1], [0], [0], [1], [0, 0, 1, 1], [], []>} : vector<8x16xf32>, vector<16x32xf32>, vector<8x32xf32> -> vector<8x32xf32>
    %cst_90 = arith.constant dense<0.000000e+00> : vector<8x32xf32>
    %305 = tpu.matmul %278, %15, %cst_90 {dimension_numbers = #tpu.dot_dimension_numbers<[1], [0], [0], [1], [0, 0, 1, 1], [], []>} : vector<8x32xf32>, vector<32x32xf32>, vector<8x32xf32> -> vector<8x32xf32>
    %306 = arith.addf %304, %305 : vector<8x32xf32>
    %307 = arith.addf %306, %21 : vector<8x32xf32>
    %308 = arith.negf %307 : vector<8x32xf32>
    %309 = math.exp %308 : vector<8x32xf32>
    %cst_91 = arith.constant 1.000000e+00 : f32
    %310 = vector.broadcast %cst_91 : f32 to vector<8x32xf32>
    %311 = arith.addf %310, %309 : vector<8x32xf32>
    %312 = arith.divf %310, %311 : vector<8x32xf32>
    %cst_92 = arith.constant dense<0.000000e+00> : vector<8x32xf32>
    %313 = tpu.matmul %303, %12, %cst_92 {dimension_numbers = #tpu.dot_dimension_numbers<[1], [0], [0], [1], [0, 0, 1, 1], [], []>} : vector<8x16xf32>, vector<16x32xf32>, vector<8x32xf32> -> vector<8x32xf32>
    %cst_93 = arith.constant dense<0.000000e+00> : vector<8x32xf32>
    %314 = tpu.matmul %278, %16, %cst_93 {dimension_numbers = #tpu.dot_dimension_numbers<[1], [0], [0], [1], [0, 0, 1, 1], [], []>} : vector<8x32xf32>, vector<32x32xf32>, vector<8x32xf32> -> vector<8x32xf32>
    %315 = arith.addf %313, %314 : vector<8x32xf32>
    %316 = arith.addf %315, %24 : vector<8x32xf32>
    %317 = arith.negf %316 : vector<8x32xf32>
    %318 = math.exp %317 : vector<8x32xf32>
    %cst_94 = arith.constant 1.000000e+00 : f32
    %319 = vector.broadcast %cst_94 : f32 to vector<8x32xf32>
    %320 = arith.addf %319, %318 : vector<8x32xf32>
    %321 = arith.divf %319, %320 : vector<8x32xf32>
    %cst_95 = arith.constant dense<0.000000e+00> : vector<8x32xf32>
    %322 = tpu.matmul %303, %13, %cst_95 {dimension_numbers = #tpu.dot_dimension_numbers<[1], [0], [0], [1], [0, 0, 1, 1], [], []>} : vector<8x16xf32>, vector<16x32xf32>, vector<8x32xf32> -> vector<8x32xf32>
    %cst_96 = arith.constant dense<0.000000e+00> : vector<8x32xf32>
    %323 = tpu.matmul %278, %17, %cst_96 {dimension_numbers = #tpu.dot_dimension_numbers<[1], [0], [0], [1], [0, 0, 1, 1], [], []>} : vector<8x32xf32>, vector<32x32xf32>, vector<8x32xf32> -> vector<8x32xf32>
    %324 = arith.addf %322, %323 : vector<8x32xf32>
    %325 = arith.addf %324, %27 : vector<8x32xf32>
    %326 = math.tanh %325 : vector<8x32xf32>
    %cst_97 = arith.constant dense<0.000000e+00> : vector<8x32xf32>
    %327 = tpu.matmul %303, %14, %cst_97 {dimension_numbers = #tpu.dot_dimension_numbers<[1], [0], [0], [1], [0, 0, 1, 1], [], []>} : vector<8x16xf32>, vector<16x32xf32>, vector<8x32xf32> -> vector<8x32xf32>
    %cst_98 = arith.constant dense<0.000000e+00> : vector<8x32xf32>
    %328 = tpu.matmul %278, %18, %cst_98 {dimension_numbers = #tpu.dot_dimension_numbers<[1], [0], [0], [1], [0, 0, 1, 1], [], []>} : vector<8x32xf32>, vector<32x32xf32>, vector<8x32xf32> -> vector<8x32xf32>
    %329 = arith.addf %327, %328 : vector<8x32xf32>
    %330 = arith.addf %329, %30 : vector<8x32xf32>
    %331 = arith.negf %330 : vector<8x32xf32>
    %332 = math.exp %331 : vector<8x32xf32>
    %cst_99 = arith.constant 1.000000e+00 : f32
    %333 = vector.broadcast %cst_99 : f32 to vector<8x32xf32>
    %334 = arith.addf %333, %332 : vector<8x32xf32>
    %335 = arith.divf %333, %334 : vector<8x32xf32>
    %336 = arith.mulf %321, %276 : vector<8x32xf32>
    %337 = arith.mulf %312, %326 : vector<8x32xf32>
    %338 = arith.addf %336, %337 : vector<8x32xf32>
    %339 = math.tanh %338 : vector<8x32xf32>
    %340 = arith.mulf %335, %339 : vector<8x32xf32>
    %c0_100 = arith.constant 0 : index
    %c64_101 = arith.constant 64 : index
    %341 = vector.load %arg7[%c0_100, %c64_101] : memref<8x128xf32, #tpu.memory_space<vmem>>, vector<8x16xf32>
    tpu.vector_store %arg7[%c0_100, %c64_101], %303 {strides = array<i32>} : memref<8x128xf32, #tpu.memory_space<vmem>>, vector<8x16xf32>,
    %c0_102 = arith.constant 0 : index
    %c128 = arith.constant 128 : index
    %342 = vector.load %arg8[%c0_102, %c128] : memref<8x256xf32, #tpu.memory_space<vmem>>, vector<8x32xf32>
    tpu.vector_store %arg8[%c0_102, %c128], %340 {strides = array<i32>} : memref<8x256xf32, #tpu.memory_space<vmem>>, vector<8x32xf32>,
    %343 = vector.extract_strided_slice %0 {offsets = [0, 80], sizes = [8, 16], strides = [1, 1]} : vector<8x128xf32> to vector<8x16xf32>
    %344 = arith.mulf %340, %4 : vector<8x32xf32>
    %345 = arith.mulf %338, %7 : vector<8x32xf32>
    %346 = arith.addf %344, %345 : vector<8x32xf32>
    %cst_103 = arith.constant dense<0.000000e+00> : vector<8xf32>
    %347 = vector.multi_reduction <add>, %346, %cst_103 [1] : vector<8x32xf32> to vector<8xf32>
    %348 = vector.shape_cast %347 : vector<8xf32> to vector<8x1xf32>
    %349 = vector.broadcast %348 : vector<8x1xf32> to vector<8x16xf32>
    %350 = arith.addf %1, %349 : vector<8x16xf32>
    %cst_104 = arith.constant dense<0xFF800000> : vector<8xf32>
    %351 = vector.multi_reduction <maximumf>, %350, %cst_104 [1] : vector<8x16xf32> to vector<8xf32>
    %352 = vector.shape_cast %351 : vector<8xf32> to vector<8x1xf32>
    %353 = vector.broadcast %352 : vector<8x1xf32> to vector<8x16xf32>
    %354 = arith.subf %350, %353 : vector<8x16xf32>
    %355 = math.exp %354 : vector<8x16xf32>
    %356 = arith.mulf %355, %343 : vector<8x16xf32>
    %cst_105 = arith.constant dense<0.000000e+00> : vector<8xf32>
    %357 = vector.multi_reduction <add>, %355, %cst_105 [1] : vector<8x16xf32> to vector<8xf32>
    %358 = vector.shape_cast %357 : vector<8xf32> to vector<8x1xf32>
    %359 = tpu.reciprocal %358 {approx = true} : vector<8x1xf32> -> vector<8x1xf32>
    %360 = arith.mulf %358, %359 : vector<8x1xf32>
    %cst_106 = arith.constant 2.000000e+00 : f32
    %361 = vector.broadcast %cst_106 : f32 to vector<8x1xf32>
    %362 = arith.subf %361, %360 : vector<8x1xf32>
    %363 = arith.mulf %359, %362 : vector<8x1xf32>
    %364 = vector.broadcast %363 : vector<8x1xf32> to vector<8x16xf32>
    %365 = arith.mulf %356, %364 : vector<8x16xf32>
    %cst_107 = arith.constant dense<0.000000e+00> : vector<8x32xf32>
    %366 = tpu.matmul %365, %11, %cst_107 {dimension_numbers = #tpu.dot_dimension_numbers<[1], [0], [0], [1], [0, 0, 1, 1], [], []>} : vector<8x16xf32>, vector<16x32xf32>, vector<8x32xf32> -> vector<8x32xf32>
    %cst_108 = arith.constant dense<0.000000e+00> : vector<8x32xf32>
    %367 = tpu.matmul %340, %15, %cst_108 {dimension_numbers = #tpu.dot_dimension_numbers<[1], [0], [0], [1], [0, 0, 1, 1], [], []>} : vector<8x32xf32>, vector<32x32xf32>, vector<8x32xf32> -> vector<8x32xf32>
    %368 = arith.addf %366, %367 : vector<8x32xf32>
    %369 = arith.addf %368, %21 : vector<8x32xf32>
    %370 = arith.negf %369 : vector<8x32xf32>
    %371 = math.exp %370 : vector<8x32xf32>
    %cst_109 = arith.constant 1.000000e+00 : f32
    %372 = vector.broadcast %cst_109 : f32 to vector<8x32xf32>
    %373 = arith.addf %372, %371 : vector<8x32xf32>
    %374 = arith.divf %372, %373 : vector<8x32xf32>
    %cst_110 = arith.constant dense<0.000000e+00> : vector<8x32xf32>
    %375 = tpu.matmul %365, %12, %cst_110 {dimension_numbers = #tpu.dot_dimension_numbers<[1], [0], [0], [1], [0, 0, 1, 1], [], []>} : vector<8x16xf32>, vector<16x32xf32>, vector<8x32xf32> -> vector<8x32xf32>
    %cst_111 = arith.constant dense<0.000000e+00> : vector<8x32xf32>
    %376 = tpu.matmul %340, %16, %cst_111 {dimension_numbers = #tpu.dot_dimension_numbers<[1], [0], [0], [1], [0, 0, 1, 1], [], []>} : vector<8x32xf32>, vector<32x32xf32>, vector<8x32xf32> -> vector<8x32xf32>
    %377 = arith.addf %375, %376 : vector<8x32xf32>
    %378 = arith.addf %377, %24 : vector<8x32xf32>
    %379 = arith.negf %378 : vector<8x32xf32>
    %380 = math.exp %379 : vector<8x32xf32>
    %cst_112 = arith.constant 1.000000e+00 : f32
    %381 = vector.broadcast %cst_112 : f32 to vector<8x32xf32>
    %382 = arith.addf %381, %380 : vector<8x32xf32>
    %383 = arith.divf %381, %382 : vector<8x32xf32>
    %cst_113 = arith.constant dense<0.000000e+00> : vector<8x32xf32>
    %384 = tpu.matmul %365, %13, %cst_113 {dimension_numbers = #tpu.dot_dimension_numbers<[1], [0], [0], [1], [0, 0, 1, 1], [], []>} : vector<8x16xf32>, vector<16x32xf32>, vector<8x32xf32> -> vector<8x32xf32>
    %cst_114 = arith.constant dense<0.000000e+00> : vector<8x32xf32>
    %385 = tpu.matmul %340, %17, %cst_114 {dimension_numbers = #tpu.dot_dimension_numbers<[1], [0], [0], [1], [0, 0, 1, 1], [], []>} : vector<8x32xf32>, vector<32x32xf32>, vector<8x32xf32> -> vector<8x32xf32>
    %386 = arith.addf %384, %385 : vector<8x32xf32>
    %387 = arith.addf %386, %27 : vector<8x32xf32>
    %388 = math.tanh %387 : vector<8x32xf32>
    %cst_115 = arith.constant dense<0.000000e+00> : vector<8x32xf32>
    %389 = tpu.matmul %365, %14, %cst_115 {dimension_numbers = #tpu.dot_dimension_numbers<[1], [0], [0], [1], [0, 0, 1, 1], [], []>} : vector<8x16xf32>, vector<16x32xf32>, vector<8x32xf32> -> vector<8x32xf32>
    %cst_116 = arith.constant dense<0.000000e+00> : vector<8x32xf32>
    %390 = tpu.matmul %340, %18, %cst_116 {dimension_numbers = #tpu.dot_dimension_numbers<[1], [0], [0], [1], [0, 0, 1, 1], [], []>} : vector<8x32xf32>, vector<32x32xf32>, vector<8x32xf32> -> vector<8x32xf32>
    %391 = arith.addf %389, %390 : vector<8x32xf32>
    %392 = arith.addf %391, %30 : vector<8x32xf32>
    %393 = arith.negf %392 : vector<8x32xf32>
    %394 = math.exp %393 : vector<8x32xf32>
    %cst_117 = arith.constant 1.000000e+00 : f32
    %395 = vector.broadcast %cst_117 : f32 to vector<8x32xf32>
    %396 = arith.addf %395, %394 : vector<8x32xf32>
    %397 = arith.divf %395, %396 : vector<8x32xf32>
    %398 = arith.mulf %383, %338 : vector<8x32xf32>
    %399 = arith.mulf %374, %388 : vector<8x32xf32>
    %400 = arith.addf %398, %399 : vector<8x32xf32>
    %401 = math.tanh %400 : vector<8x32xf32>
    %402 = arith.mulf %397, %401 : vector<8x32xf32>
    %c0_118 = arith.constant 0 : index
    %c80 = arith.constant 80 : index
    %403 = vector.load %arg7[%c0_118, %c80] : memref<8x128xf32, #tpu.memory_space<vmem>>, vector<8x16xf32>
    tpu.vector_store %arg7[%c0_118, %c80], %365 {strides = array<i32>} : memref<8x128xf32, #tpu.memory_space<vmem>>, vector<8x16xf32>,
    %c0_119 = arith.constant 0 : index
    %c160 = arith.constant 160 : index
    %404 = vector.load %arg8[%c0_119, %c160] : memref<8x256xf32, #tpu.memory_space<vmem>>, vector<8x32xf32>
    tpu.vector_store %arg8[%c0_119, %c160], %402 {strides = array<i32>} : memref<8x256xf32, #tpu.memory_space<vmem>>, vector<8x32xf32>,
    %405 = vector.extract_strided_slice %0 {offsets = [0, 96], sizes = [8, 16], strides = [1, 1]} : vector<8x128xf32> to vector<8x16xf32>
    %406 = arith.mulf %402, %4 : vector<8x32xf32>
    %407 = arith.mulf %400, %7 : vector<8x32xf32>
    %408 = arith.addf %406, %407 : vector<8x32xf32>
    %cst_120 = arith.constant dense<0.000000e+00> : vector<8xf32>
    %409 = vector.multi_reduction <add>, %408, %cst_120 [1] : vector<8x32xf32> to vector<8xf32>
    %410 = vector.shape_cast %409 : vector<8xf32> to vector<8x1xf32>
    %411 = vector.broadcast %410 : vector<8x1xf32> to vector<8x16xf32>
    %412 = arith.addf %1, %411 : vector<8x16xf32>
    %cst_121 = arith.constant dense<0xFF800000> : vector<8xf32>
    %413 = vector.multi_reduction <maximumf>, %412, %cst_121 [1] : vector<8x16xf32> to vector<8xf32>
    %414 = vector.shape_cast %413 : vector<8xf32> to vector<8x1xf32>
    %415 = vector.broadcast %414 : vector<8x1xf32> to vector<8x16xf32>
    %416 = arith.subf %412, %415 : vector<8x16xf32>
    %417 = math.exp %416 : vector<8x16xf32>
    %418 = arith.mulf %417, %405 : vector<8x16xf32>
    %cst_122 = arith.constant dense<0.000000e+00> : vector<8xf32>
    %419 = vector.multi_reduction <add>, %417, %cst_122 [1] : vector<8x16xf32> to vector<8xf32>
    %420 = vector.shape_cast %419 : vector<8xf32> to vector<8x1xf32>
    %421 = tpu.reciprocal %420 {approx = true} : vector<8x1xf32> -> vector<8x1xf32>
    %422 = arith.mulf %420, %421 : vector<8x1xf32>
    %cst_123 = arith.constant 2.000000e+00 : f32
    %423 = vector.broadcast %cst_123 : f32 to vector<8x1xf32>
    %424 = arith.subf %423, %422 : vector<8x1xf32>
    %425 = arith.mulf %421, %424 : vector<8x1xf32>
    %426 = vector.broadcast %425 : vector<8x1xf32> to vector<8x16xf32>
    %427 = arith.mulf %418, %426 : vector<8x16xf32>
    %cst_124 = arith.constant dense<0.000000e+00> : vector<8x32xf32>
    %428 = tpu.matmul %427, %11, %cst_124 {dimension_numbers = #tpu.dot_dimension_numbers<[1], [0], [0], [1], [0, 0, 1, 1], [], []>} : vector<8x16xf32>, vector<16x32xf32>, vector<8x32xf32> -> vector<8x32xf32>
    %cst_125 = arith.constant dense<0.000000e+00> : vector<8x32xf32>
    %429 = tpu.matmul %402, %15, %cst_125 {dimension_numbers = #tpu.dot_dimension_numbers<[1], [0], [0], [1], [0, 0, 1, 1], [], []>} : vector<8x32xf32>, vector<32x32xf32>, vector<8x32xf32> -> vector<8x32xf32>
    %430 = arith.addf %428, %429 : vector<8x32xf32>
    %431 = arith.addf %430, %21 : vector<8x32xf32>
    %432 = arith.negf %431 : vector<8x32xf32>
    %433 = math.exp %432 : vector<8x32xf32>
    %cst_126 = arith.constant 1.000000e+00 : f32
    %434 = vector.broadcast %cst_126 : f32 to vector<8x32xf32>
    %435 = arith.addf %434, %433 : vector<8x32xf32>
    %436 = arith.divf %434, %435 : vector<8x32xf32>
    %cst_127 = arith.constant dense<0.000000e+00> : vector<8x32xf32>
    %437 = tpu.matmul %427, %12, %cst_127 {dimension_numbers = #tpu.dot_dimension_numbers<[1], [0], [0], [1], [0, 0, 1, 1], [], []>} : vector<8x16xf32>, vector<16x32xf32>, vector<8x32xf32> -> vector<8x32xf32>
    %cst_128 = arith.constant dense<0.000000e+00> : vector<8x32xf32>
    %438 = tpu.matmul %402, %16, %cst_128 {dimension_numbers = #tpu.dot_dimension_numbers<[1], [0], [0], [1], [0, 0, 1, 1], [], []>} : vector<8x32xf32>, vector<32x32xf32>, vector<8x32xf32> -> vector<8x32xf32>
    %439 = arith.addf %437, %438 : vector<8x32xf32>
    %440 = arith.addf %439, %24 : vector<8x32xf32>
    %441 = arith.negf %440 : vector<8x32xf32>
    %442 = math.exp %441 : vector<8x32xf32>
    %cst_129 = arith.constant 1.000000e+00 : f32
    %443 = vector.broadcast %cst_129 : f32 to vector<8x32xf32>
    %444 = arith.addf %443, %442 : vector<8x32xf32>
    %445 = arith.divf %443, %444 : vector<8x32xf32>
    %cst_130 = arith.constant dense<0.000000e+00> : vector<8x32xf32>
    %446 = tpu.matmul %427, %13, %cst_130 {dimension_numbers = #tpu.dot_dimension_numbers<[1], [0], [0], [1], [0, 0, 1, 1], [], []>} : vector<8x16xf32>, vector<16x32xf32>, vector<8x32xf32> -> vector<8x32xf32>
    %cst_131 = arith.constant dense<0.000000e+00> : vector<8x32xf32>
    %447 = tpu.matmul %402, %17, %cst_131 {dimension_numbers = #tpu.dot_dimension_numbers<[1], [0], [0], [1], [0, 0, 1, 1], [], []>} : vector<8x32xf32>, vector<32x32xf32>, vector<8x32xf32> -> vector<8x32xf32>
    %448 = arith.addf %446, %447 : vector<8x32xf32>
    %449 = arith.addf %448, %27 : vector<8x32xf32>
    %450 = math.tanh %449 : vector<8x32xf32>
    %cst_132 = arith.constant dense<0.000000e+00> : vector<8x32xf32>
    %451 = tpu.matmul %427, %14, %cst_132 {dimension_numbers = #tpu.dot_dimension_numbers<[1], [0], [0], [1], [0, 0, 1, 1], [], []>} : vector<8x16xf32>, vector<16x32xf32>, vector<8x32xf32> -> vector<8x32xf32>
    %cst_133 = arith.constant dense<0.000000e+00> : vector<8x32xf32>
    %452 = tpu.matmul %402, %18, %cst_133 {dimension_numbers = #tpu.dot_dimension_numbers<[1], [0], [0], [1], [0, 0, 1, 1], [], []>} : vector<8x32xf32>, vector<32x32xf32>, vector<8x32xf32> -> vector<8x32xf32>
    %453 = arith.addf %451, %452 : vector<8x32xf32>
    %454 = arith.addf %453, %30 : vector<8x32xf32>
    %455 = arith.negf %454 : vector<8x32xf32>
    %456 = math.exp %455 : vector<8x32xf32>
    %cst_134 = arith.constant 1.000000e+00 : f32
    %457 = vector.broadcast %cst_134 : f32 to vector<8x32xf32>
    %458 = arith.addf %457, %456 : vector<8x32xf32>
    %459 = arith.divf %457, %458 : vector<8x32xf32>
    %460 = arith.mulf %445, %400 : vector<8x32xf32>
    %461 = arith.mulf %436, %450 : vector<8x32xf32>
    %462 = arith.addf %460, %461 : vector<8x32xf32>
    %463 = math.tanh %462 : vector<8x32xf32>
    %464 = arith.mulf %459, %463 : vector<8x32xf32>
    %c0_135 = arith.constant 0 : index
    %c96_136 = arith.constant 96 : index
    %465 = vector.load %arg7[%c0_135, %c96_136] : memref<8x128xf32, #tpu.memory_space<vmem>>, vector<8x16xf32>
    tpu.vector_store %arg7[%c0_135, %c96_136], %427 {strides = array<i32>} : memref<8x128xf32, #tpu.memory_space<vmem>>, vector<8x16xf32>,
    %c0_137 = arith.constant 0 : index
    %c192 = arith.constant 192 : index
    %466 = vector.load %arg8[%c0_137, %c192] : memref<8x256xf32, #tpu.memory_space<vmem>>, vector<8x32xf32>
    tpu.vector_store %arg8[%c0_137, %c192], %464 {strides = array<i32>} : memref<8x256xf32, #tpu.memory_space<vmem>>, vector<8x32xf32>,
    %467 = vector.extract_strided_slice %0 {offsets = [0, 112], sizes = [8, 16], strides = [1, 1]} : vector<8x128xf32> to vector<8x16xf32>
    %468 = arith.mulf %464, %4 : vector<8x32xf32>
    %469 = arith.mulf %462, %7 : vector<8x32xf32>
    %470 = arith.addf %468, %469 : vector<8x32xf32>
    %cst_138 = arith.constant dense<0.000000e+00> : vector<8xf32>
    %471 = vector.multi_reduction <add>, %470, %cst_138 [1] : vector<8x32xf32> to vector<8xf32>
    %472 = vector.shape_cast %471 : vector<8xf32> to vector<8x1xf32>
    %473 = vector.broadcast %472 : vector<8x1xf32> to vector<8x16xf32>
    %474 = arith.addf %1, %473 : vector<8x16xf32>
    %cst_139 = arith.constant dense<0xFF800000> : vector<8xf32>
    %475 = vector.multi_reduction <maximumf>, %474, %cst_139 [1] : vector<8x16xf32> to vector<8xf32>
    %476 = vector.shape_cast %475 : vector<8xf32> to vector<8x1xf32>
    %477 = vector.broadcast %476 : vector<8x1xf32> to vector<8x16xf32>
    %478 = arith.subf %474, %477 : vector<8x16xf32>
    %479 = math.exp %478 : vector<8x16xf32>
    %480 = arith.mulf %479, %467 : vector<8x16xf32>
    %cst_140 = arith.constant dense<0.000000e+00> : vector<8xf32>
    %481 = vector.multi_reduction <add>, %479, %cst_140 [1] : vector<8x16xf32> to vector<8xf32>
    %482 = vector.shape_cast %481 : vector<8xf32> to vector<8x1xf32>
    %483 = tpu.reciprocal %482 {approx = true} : vector<8x1xf32> -> vector<8x1xf32>
    %484 = arith.mulf %482, %483 : vector<8x1xf32>
    %cst_141 = arith.constant 2.000000e+00 : f32
    %485 = vector.broadcast %cst_141 : f32 to vector<8x1xf32>
    %486 = arith.subf %485, %484 : vector<8x1xf32>
    %487 = arith.mulf %483, %486 : vector<8x1xf32>
    %488 = vector.broadcast %487 : vector<8x1xf32> to vector<8x16xf32>
    %489 = arith.mulf %480, %488 : vector<8x16xf32>
    %cst_142 = arith.constant dense<0.000000e+00> : vector<8x32xf32>
    %490 = tpu.matmul %489, %11, %cst_142 {dimension_numbers = #tpu.dot_dimension_numbers<[1], [0], [0], [1], [0, 0, 1, 1], [], []>} : vector<8x16xf32>, vector<16x32xf32>, vector<8x32xf32> -> vector<8x32xf32>
    %cst_143 = arith.constant dense<0.000000e+00> : vector<8x32xf32>
    %491 = tpu.matmul %464, %15, %cst_143 {dimension_numbers = #tpu.dot_dimension_numbers<[1], [0], [0], [1], [0, 0, 1, 1], [], []>} : vector<8x32xf32>, vector<32x32xf32>, vector<8x32xf32> -> vector<8x32xf32>
    %492 = arith.addf %490, %491 : vector<8x32xf32>
    %493 = arith.addf %492, %21 : vector<8x32xf32>
    %494 = arith.negf %493 : vector<8x32xf32>
    %495 = math.exp %494 : vector<8x32xf32>
    %cst_144 = arith.constant 1.000000e+00 : f32
    %496 = vector.broadcast %cst_144 : f32 to vector<8x32xf32>
    %497 = arith.addf %496, %495 : vector<8x32xf32>
    %498 = arith.divf %496, %497 : vector<8x32xf32>
    %cst_145 = arith.constant dense<0.000000e+00> : vector<8x32xf32>
    %499 = tpu.matmul %489, %12, %cst_145 {dimension_numbers = #tpu.dot_dimension_numbers<[1], [0], [0], [1], [0, 0, 1, 1], [], []>} : vector<8x16xf32>, vector<16x32xf32>, vector<8x32xf32> -> vector<8x32xf32>
    %cst_146 = arith.constant dense<0.000000e+00> : vector<8x32xf32>
    %500 = tpu.matmul %464, %16, %cst_146 {dimension_numbers = #tpu.dot_dimension_numbers<[1], [0], [0], [1], [0, 0, 1, 1], [], []>} : vector<8x32xf32>, vector<32x32xf32>, vector<8x32xf32> -> vector<8x32xf32>
    %501 = arith.addf %499, %500 : vector<8x32xf32>
    %502 = arith.addf %501, %24 : vector<8x32xf32>
    %503 = arith.negf %502 : vector<8x32xf32>
    %504 = math.exp %503 : vector<8x32xf32>
    %cst_147 = arith.constant 1.000000e+00 : f32
    %505 = vector.broadcast %cst_147 : f32 to vector<8x32xf32>
    %506 = arith.addf %505, %504 : vector<8x32xf32>
    %507 = arith.divf %505, %506 : vector<8x32xf32>
    %cst_148 = arith.constant dense<0.000000e+00> : vector<8x32xf32>
    %508 = tpu.matmul %489, %13, %cst_148 {dimension_numbers = #tpu.dot_dimension_numbers<[1], [0], [0], [1], [0, 0, 1, 1], [], []>} : vector<8x16xf32>, vector<16x32xf32>, vector<8x32xf32> -> vector<8x32xf32>
    %cst_149 = arith.constant dense<0.000000e+00> : vector<8x32xf32>
    %509 = tpu.matmul %464, %17, %cst_149 {dimension_numbers = #tpu.dot_dimension_numbers<[1], [0], [0], [1], [0, 0, 1, 1], [], []>} : vector<8x32xf32>, vector<32x32xf32>, vector<8x32xf32> -> vector<8x32xf32>
    %510 = arith.addf %508, %509 : vector<8x32xf32>
    %511 = arith.addf %510, %27 : vector<8x32xf32>
    %512 = math.tanh %511 : vector<8x32xf32>
    %cst_150 = arith.constant dense<0.000000e+00> : vector<8x32xf32>
    %513 = tpu.matmul %489, %14, %cst_150 {dimension_numbers = #tpu.dot_dimension_numbers<[1], [0], [0], [1], [0, 0, 1, 1], [], []>} : vector<8x16xf32>, vector<16x32xf32>, vector<8x32xf32> -> vector<8x32xf32>
    %cst_151 = arith.constant dense<0.000000e+00> : vector<8x32xf32>
    %514 = tpu.matmul %464, %18, %cst_151 {dimension_numbers = #tpu.dot_dimension_numbers<[1], [0], [0], [1], [0, 0, 1, 1], [], []>} : vector<8x32xf32>, vector<32x32xf32>, vector<8x32xf32> -> vector<8x32xf32>
    %515 = arith.addf %513, %514 : vector<8x32xf32>
    %516 = arith.addf %515, %30 : vector<8x32xf32>
    %517 = arith.negf %516 : vector<8x32xf32>
    %518 = math.exp %517 : vector<8x32xf32>
    %cst_152 = arith.constant 1.000000e+00 : f32
    %519 = vector.broadcast %cst_152 : f32 to vector<8x32xf32>
    %520 = arith.addf %519, %518 : vector<8x32xf32>
    %521 = arith.divf %519, %520 : vector<8x32xf32>
    %522 = arith.mulf %507, %462 : vector<8x32xf32>
    %523 = arith.mulf %498, %512 : vector<8x32xf32>
    %524 = arith.addf %522, %523 : vector<8x32xf32>
    %525 = math.tanh %524 : vector<8x32xf32>
    %526 = arith.mulf %521, %525 : vector<8x32xf32>
    %c0_153 = arith.constant 0 : index
    %c112 = arith.constant 112 : index
    %527 = vector.load %arg7[%c0_153, %c112] : memref<8x128xf32, #tpu.memory_space<vmem>>, vector<8x16xf32>
    tpu.vector_store %arg7[%c0_153, %c112], %489 {strides = array<i32>} : memref<8x128xf32, #tpu.memory_space<vmem>>, vector<8x16xf32>,
    %c0_154 = arith.constant 0 : index
    %c224 = arith.constant 224 : index
    %528 = vector.load %arg8[%c0_154, %c224] : memref<8x256xf32, #tpu.memory_space<vmem>>, vector<8x32xf32>
    tpu.vector_store %arg8[%c0_154, %c224], %526 {strides = array<i32>} : memref<8x256xf32, #tpu.memory_space<vmem>>, vector<8x32xf32>,
    return
  }
}

</mosaic_0001>

<bundles_post_ra>
// kernel: tpu_custom_call.1
= control target key start
LH: loop header
LB: loop body
LE: loop exit
PB: predicated region body
PF: predicated region fallthrough
CT: control target
= control target key end

     0   :  { %14 = vsyncpa [#allocation3], 0  ;;  %s3512_s0 = inlined_call_operand.hbm [shape: f32[8,128], index: 0, kind: input, shape index: {}]   ;;  %s3513_s1 = inlined_call_operand.hbm [shape: f32[8,16], index: 1, kind: input, shape index: {}]   ;;  %s3514_s2 = inlined_call_operand.hbm [shape: f32[16,128], index: 2, kind: input, shape index: {}]   ;;  %s3515_s3 = inlined_call_operand.hbm [shape: f32[32,128], index: 3, kind: input, shape index: {}]   ;;  %s3516_s4 = inlined_call_operand.vmem [shape: f32[1,128], index: 4, kind: input, shape index: {}]   ;;  %s3517_s5 = inlined_call_operand.vmem [shape: f32[1,32], index: 5, kind: input, shape index: {}]   ;;  %s3518_s6 = inlined_call_operand.vmem [shape: f32[1,32], index: 6, kind: input, shape index: {}]   ;;  %s3519_s7 = inlined_call_operand.hbm [shape: f32[8,128], index: 7, kind: output, shape index: {0}]   ;;  %s3520_s8 = inlined_call_operand.hbm [shape: f32[8,256], index: 8, kind: output, shape index: {1}]  }
   0x1   :  { %15 = vsyncpa [#allocation6], 0 }
   0x2   :  { %16 = vsyncpa [#allocation9], 0 }
   0x3   :  { %17 = vsyncpa [#allocation4], 0  ;;  %s35_s29 = sshll.u32 %s3513_s1, 4  ;;  %s36_s29 = int_to_ptr.hbm [resolvable:$true] %s35_s29 }
   0x4   :  { %18 = vsyncpa [#allocation12], 0  ;;  %s2819_s30 = smov [#allocation5]   ;;  %s24_s12 = sshll.u32 %s3512_s0, 4  ;;  %s25_s12 = int_to_ptr.hbm [resolvable:$true] %s24_s12 }
   0x5   :  { %s37_s9 = sshll.u32 %s2819_s30, 4  ;;  %s2820_s13 = smov [#allocation2]   ;;  %s38_s9 = int_to_ptr.vmem [resolvable:$true] %s37_s9 }
   0x6   :  { %40 = dma.hbm_to_vmem [thread:$0]  %s36_s29, 128, %s38_s9, [#allocation6]  }
   0x7   :  { %s26_s14 = sshll.u32 %s2820_s13, 4  ;;  %s45_s17 = sshll.u32 %s3514_s2, 4  ;;  %s27_s14 = int_to_ptr.vmem [resolvable:$true] %s26_s14  ;;  %s46_s17 = int_to_ptr.hbm [resolvable:$true] %s45_s17 }
   0x8   :  { %29 = dma.hbm_to_vmem [thread:$0]  %s25_s12, 128, %s27_s14, [#allocation3]  }
   0x9   :  { %s2821_s1 = smov [#allocation7]   ;;  %s58_s21 = sshll.u32 %s3515_s3, 4  ;;  %s59_s21 = int_to_ptr.hbm [resolvable:$true] %s58_s21 }
   0xa   :  { %s47_s18 = sshll.u32 %s2821_s1, 4  ;;  %s2822_s22 = smov 128   ;;  %s48_s18 = int_to_ptr.vmem [resolvable:$true] %s47_s18 }
   0xb   :  { %s2823_s0 = smov 8   ;;  %s2824_s23 = smov [#allocation8]  }
   0xc   :  { %53 = dma.hbm_to_vmem [thread:$0]  %s46_s17, 256, %s48_s18, [#allocation6], %s2822_s22, %s2822_s22, %s2823_s0  }
   0xd   :  { %s60_s24 = sshll.u32 %s2824_s23, 4  ;;  %s61_s24 = int_to_ptr.vmem [resolvable:$true] %s60_s24 }
   0xe   :  { %66 = dma.hbm_to_vmem [thread:$0]  %s59_s21, 512, %s61_s24, [#allocation9], %s2822_s22, %s2822_s22, %s2823_s0  }
   0xf   :  { %2809 = dma.done.wait [#allocation3], 128  }
  0x10   :  { %2810 = vsyncadd [#allocation3], 4294967168 }
  0x11   :  { %2811 = dma.done.wait [#allocation6], 384  }
  0x12   :  { %2812 = vsyncadd [#allocation6], 4294966912 }
  0x13   :  { %2813 = dma.done.wait [#allocation9], 512  }
  0x14   :  { %2814 = vsyncadd [#allocation9], 4294966784  ;;  %v2895_v0 = vld [vmem:[%s3517_s5] ss:$0 sm:$0xff]  ;;  %vm112_vm0 = vcmask 261120   ;;  %v2905_v6 = vld [vmem:[#allocation7 + $0x8] sm:$0xff] }
  0x15   :  { %v2900_v1 = vld [vmem:[%s3518_s6] ss:$0 sm:$0xff]  ;;  %v109_v2 = vmul.f32 0.0, %v2895_v0  ;;  %v2907_v7 = vld [vmem:[#allocation8 + $0x18] sm:$0xff]  ;;  %173 = vmatpush.msra.mxu1 %v2905_v6  ;;  %v2911_v8 = vld [vmem:[#allocation8 + $0x8] sm:$0xff]  ;;  %s2825_s27 = smov 96  }
  0x16   :  { %v110_v3 = vmul.f32 0.0, %v2900_v1  ;;  %148 = vmatpush.msra.mxu0 %v2907_v7  ;;  %v2913_v9 = vld [vmem:[#allocation8 + $0x10] sm:$0xff]  ;;  %v2448_v11 = vpack.i.bf16 %v2905_v6, %v2911_v8  ;;  %v2925_v13 = vld [vmem:[#allocation8] sm:$0xff]  ;;  %v2928_v14 = vld [vmem:[#allocation5] sm:$0xff]  ;;  %vm117_vm1 = vcmask 130048   ;;  %s2826_s28 = smov 32   ;;  %v2458_v21 = vpack.i.bf16 %v2907_v7, %v2905_v6 }
  0x17   :  { %v2915_v10 = vld [vmem:[#allocation7] sm:$0xff]  ;;  %v2443_v12 = vpack.i.bf16 %v2913_v9, %v2907_v7  ;;  %v2468_v20 = vpack.i.bf16 %v2925_v13, %v2911_v8  ;;  %v2827_v30 = vmov 0.0   ;;  %s2828_s29 = smov 64   ;;  %v3007_v50 = vld [vmem:[%s3516_s4] ss:$0 sm:$0xff]  ;;  %s2829_s10 = smov 112  }
  0x18   :  { %v111_v4 = vadd.f32 %v110_v3, %v109_v2  ;;  %149 = vmatpush.msra.mxu0 %v2913_v9  ;;  %174 = vmatpush.msra.mxu1 %v2915_v10  ;;  %v2453_v15 = vpack.i.bf16 %v2915_v10, %v2925_v13  ;;  %v2463_v19 = vpack.i.bf16 %v2913_v9, %v2915_v10  ;;  %v3015_v53 = vld [vmem:[#allocation2] sm:$0xff]  ;;  %s2830_s15 = smov 80   ;;  %s2832_s1 = smov 16  }
  0x19   :  { %2449 = vrot.lane.b32.xlu2 %v2448_v11, %s2825_s27  ;;  %2444 = vrot.lane.b32.xlu1 %v2443_v12, %s2825_s27  ;;  %s2315_s22 = sshll.u32 %s3519_s7, 4  ;;  %s2833_s0 = smov [#allocation10]   ;;  %s2316_s22 = int_to_ptr.hbm [resolvable:$true] %s2315_s22 }
  0x1a   :  { %v113_v5 = vsel %vm112_vm0, %v111_v4, 0.0  ;;  %150 = vmatpush.msra.mxu0 %v2911_v8  ;;  %s2313_s23 = sshll.u32 %s2833_s0, 4  ;;  %s2834_s7 = smov [#allocation11]   ;;  %s2314_s23 = int_to_ptr.vmem [resolvable:$true] %s2313_s23 }
  0x1b   :  { %114 = vadd.xlane.f32.xlu0 %v113_v5  ;;  %s2324_s24 = sshll.u32 %s2834_s7, 4  ;;  %s2326_s3 = sshll.u32 %s3520_s8, 4  ;;  %s2325_s24 = int_to_ptr.vmem [resolvable:$true] %s2324_s24  ;;  %s2327_s3 = int_to_ptr.hbm [resolvable:$true] %s2326_s3 }
  0x1c   :  { %151 = vmatpush.msra.mxu0 %v2925_v13 }
  0x1d   :  { %152 = vmatmul.f32.vlgmr.msra.gmra.mxu0 %v2827_v30 }
  0x21   :  { %2454 = vrot.lane.b32.xlu2 %v2453_v15, %s2825_s27 }
  0x29   :  { %2464 = vrot.lane.b32.xlu2 %v2463_v19, %s2826_s28 }
  0x31   :  { %2469 = vrot.lane.b32.xlu2 %v2468_v20, %s2826_s28 }
  0x39   :  { %2474 = vrot.lane.b32.xlu2 %v2458_v21, %s2828_s29 }
  0x41   :  { %263 = vrot.lane.b32.xlu2 %v3007_v50, %s2825_s27 }
  0x73   :  { %v2450_v25 = vpop.permute.xlu2 %2449 }
  0x74   :  { %v2945_v27 = vunpack.i.h.bf16 %v2450_v25  ;;  %v2954_v31 = vunpack.i.l.bf16 %v2450_v25 }
  0x76   :  { %257 = vmatpush.msra.mxu3 %v2945_v27 }
  0x7b   :  { %v2455_v34 = vpop.permute.xlu2 %2454 }
  0x7c   :  { %v2961_v35 = vunpack.i.h.bf16 %v2455_v34  ;;  %v2963_v36 = vunpack.i.l.bf16 %v2455_v34 }
  0x7e   :  { %258 = vmatpush.msra.mxu3 %v2961_v35 }
  0x83   :  { %v2465_v40 = vpop.permute.xlu2 %2464 }
  0x84   :  { %v2974_v41 = vunpack.i.h.bf16 %v2465_v40  ;;  %v2976_v42 = vunpack.i.l.bf16 %v2465_v40 }
  0x8b   :  { %v2445_v26 = vpop.permute.xlu1 %2444  ;;  %v2470_v43 = vpop.permute.xlu2 %2469 }
  0x8c   :  { %v2947_v28 = vunpack.i.h.bf16 %v2445_v26  ;;  %v2949_v29 = vunpack.i.l.bf16 %v2445_v26  ;;  %v2982_v44 = vunpack.i.h.bf16 %v2470_v43  ;;  %v2984_v45 = vunpack.i.l.bf16 %v2470_v43 }
  0x8e   :  { %v115_v16 = vpop.xlane.xlu0 %114  ;;  %227 = vmatpush.msra.mxu2 %v2949_v29 }
  0x8f   :  { %v116_v17 = vadd.f32 %v115_v16, %v2928_v14 }
  0x90   :  { %228 = vmatpush.msra.mxu2 %v2947_v28 }
  0x91   :  { %v118_v18 = vsel %vm117_vm1, %v116_v17, -inf }
  0x92   :  { %119 = vmax.xlane.f32.xlu0 %v118_v18  ;;  %229 = vmatpush.msra.mxu2 %v2954_v31 }
  0x93   :  { %v2475_v46 = vpop.permute.xlu2 %2474 }
  0x94   :  { %230 = vmatpush.msra.mxu2 %v2963_v36  ;;  %v2998_v47 = vunpack.i.h.bf16 %v2475_v46  ;;  %v3000_v48 = vunpack.i.l.bf16 %v2475_v46 }
  0x95   :  { %231 = vmatmul.f32.vlgmr.msra.gmra.mxu2 %v2827_v30 }
  0x96   :  { %310 = vmatpush.msrb.mxu1 %v2998_v47  ;;  %338 = vmatpush.msrb.mxu3 %v3000_v48 }
  0x9a   :  { %v153_v2 = vpop.f32.mrf.mxu0 }
  0xa6   :  { %2459 = vrot.lane.b32.xlu0 %v2458_v21, %s2826_s28 }
  0xae   :  { %2484 = vrot.lane.b32.xlu0 %v2468_v20, %s2828_s29 }
  0xb6   :  { %344 = vrot.lane.b32.xlu0 %v3007_v50, %s2828_s29 }
 0x105   :  { %v120_v22 = vpop.xlane.xlu0 %119 }
 0x106   :  { %v121_v23 = vsub.f32 %v116_v17, %v120_v22  ;;  %v3051_v17 = vpop.permute.xlu2 %263 }
 0x108   :  { %v122_v24 = vmul.f32 1.442695, %v121_v23 }
 0x10a   :  { %2491 = vpow2.f32 %v122_v24 }
 0x110   :  { %v2492_v32 = vpop.eup %2491 }
 0x111   :  { %v125_v33 = vsel %vm117_vm1, %v2492_v32, 0.0  ;;  %v124_v55 = vmul.f32 %v2492_v32, %v3015_v53 }
 0x112   :  { %126 = vadd.xlane.f32.xlu1 %v125_v33 }
 0x118   :  { %v2460_v37 = vpop.permute.xlu0 %2459  ;;  %v232_v3 = vpop.f32.mrf.mxu2 }
 0x119   :  { %v2968_v38 = vunpack.i.h.bf16 %v2460_v37  ;;  %v2970_v39 = vunpack.i.l.bf16 %v2460_v37 }
 0x11b   :  { %373 = vmatpush.msrb.mxu0 %v2968_v38  ;;  %401 = vmatpush.msrb.mxu2 %v2970_v39 }
 0x11d   :  { %374 = vmatpush.msrb.mxu0 %v2974_v41  ;;  %402 = vmatpush.msrb.mxu2 %v2976_v42 }
 0x11f   :  { %563 = vmatpush.msra.mxu2 %v2945_v27  ;;  %375 = vmatpush.msrb.mxu0 %v2984_v45 }
 0x120   :  { %v2485_v58 = vpop.permute.xlu0 %2484 }
 0x121   :  { %564 = vmatpush.msra.mxu2 %v2961_v35  ;;  %376 = vmatpush.msrb.mxu0 %v2982_v44  ;;  %v3028_v62 = vunpack.i.l.bf16 %v2485_v58  ;;  %v3030_v63 = vunpack.i.h.bf16 %v2485_v58 }
 0x122   :  { %377 = vmatmul.f32.vlgmr.msrb.gmra.mxu0 %v2827_v30 }
 0x123   :  { %541 = vmatpush.msra.mxu0 %v2949_v29 }
 0x125   :  { %542 = vmatpush.msra.mxu0 %v2947_v28 }
 0x127   :  { %543 = vmatpush.msra.mxu0 %v2954_v31 }
 0x129   :  { %544 = vmatpush.msra.mxu0 %v2963_v36 }
 0x12b   :  { %2479 = vrot.lane.b32.xlu1 %v2463_v19, %s2828_s29  ;;  %643 = vmatpush.msrb.mxu0 %v2968_v38 }
 0x12d   :  { %644 = vmatpush.msrb.mxu0 %v2974_v41 }
 0x12f   :  { %645 = vmatpush.msrb.mxu0 %v2984_v45 }
 0x131   :  { %646 = vmatpush.msrb.mxu0 %v2982_v44 }
 0x133   :  { %407 = vrot.lane.b32.xlu1 %v3007_v50, %s2826_s28 }
 0x185   :  { %v127_v49 = vpop.xlane.xlu1 %126 }
 0x186   :  { %2493 = vrcp.f32 %v127_v49 }
 0x18c   :  { %v2494_v51 = vpop.eup %2493 }
 0x18d   :  { %v129_v52 = vmul.f32 %v2494_v51, %v127_v49 }
 0x18f   :  { %v130_v54 = vsub.f32 2.0, %v129_v52 }
 0x191   :  { %v131_v56 = vmul.f32 %v2494_v51, %v130_v54  ;;  %v3057_v54 = vpop.permute.xlu0 %344 }
 0x193   :  { %v132_v57 = vmul.f32 %v131_v56, %v124_v55 }
 0x195   :  { %435 = vst.msk [vmem:[#allocation10] sm:$0xff] %vm117_vm1, %v132_v57  ;;  %2343 = vmatmul.msk.f32.vlgmr.msra.gmra.mxu1 %vm117_vm1, %v132_v57  ;;  %2345 = vmatmul.msk.f32.vlgmr.msra.gmra.mxu3 %vm117_vm1, %v132_v57 }
 0x196   :  { %2348 = vmatmul.msk.f32.vlgmr.msrb.gmra.mxu2 %vm117_vm1, %v132_v57 }
 0x197   :  { %665 = vmatpush.msrb.mxu2 %v2970_v39 }
 0x199   :  { %666 = vmatpush.msrb.mxu2 %v2976_v42 }
 0x19d   :  { %v2480_v59 = vpop.permute.xlu1 %2479 }
 0x19e   :  { %v3024_v60 = vunpack.i.h.bf16 %v2480_v59  ;;  %v3026_v61 = vunpack.i.l.bf16 %v2480_v59 }
 0x19f   :  { %v378_v15 = vpop.f32.mrf.mxu0 }
 0x1a0   :  { %311 = vmatpush.msrb.mxu1 %v3024_v60  ;;  %339 = vmatpush.msrb.mxu3 %v3026_v61 }
 0x1a1   :  { %2347 = vmatmul.msk.f32.vlgmr.msrb.gmra.mxu3 %vm117_vm1, %v132_v57 }
 0x1a2   :  { %503 = vmatpush.msra.mxu3 %v2905_v6  ;;  %312 = vmatpush.msrb.mxu1 %v3028_v62 }
 0x1a4   :  { %504 = vmatpush.msra.mxu3 %v2915_v10  ;;  %313 = vmatpush.msrb.mxu1 %v3030_v63 }
 0x1a5   :  { %314 = vmatmul.f32.vlgmr.msrb.gmra.mxu1 %v2827_v30  ;;  %v3053_v20 = vpop.permute.xlu1 %407 }
 0x1a6   :  { %623 = vmatpush.msrb.mxu3 %v3000_v48  ;;  %478 = vmatpush.msra.mxu1 %v2907_v7 }
 0x1a8   :  { %624 = vmatpush.msrb.mxu3 %v3026_v61  ;;  %479 = vmatpush.msra.mxu1 %v2913_v9 }
 0x1aa   :  { %480 = vmatpush.msra.mxu1 %v2911_v8 }
 0x1ac   :  { %481 = vmatpush.msra.mxu1 %v2925_v13 }
 0x1ae   :  { %601 = vmatpush.msrb.mxu1 %v2998_v47 }
 0x1b0   :  { %602 = vmatpush.msrb.mxu1 %v3024_v60 }
 0x1b2   :  { %603 = vmatpush.msrb.mxu1 %v3028_v62 }
 0x1b4   :  { %604 = vmatpush.msrb.mxu1 %v3030_v63 }
 0x212   :  { %v176_v4 = vpop.f32.mrf.mxu1 }
 0x213   :  { %v177_v5 = vadd.f32 %v176_v4, %v153_v2 }
 0x215   :  { %v179_v11 = vadd.f32 %v3007_v50, %v177_v5 }
 0x217   :  { %v2344_v12 = vmul.f32 -1.442695, %v179_v11 }
 0x218   :  { %v260_v16 = vpop.f32.mrf.mxu3 }
 0x219   :  { %2495 = vpow2.f32 %v2344_v12  ;;  %v261_v18 = vadd.f32 %v260_v16, %v232_v3  ;;  %v404_v19 = vpop.f32.mrf.mxu2 }
 0x21a   :  { %v405_v21 = vadd.f32 %v404_v19, %v378_v15 }
 0x21b   :  { %v266_v22 = vadd.f32 %v3051_v17, %v261_v18 }
 0x21c   :  { %v410_v23 = vadd.f32 %v3053_v20, %v405_v21 }
 0x21d   :  { %v2346_v24 = vmul.f32 -1.442695, %v266_v22 }
 0x21e   :  { %v2349_v25 = vmul.f32 -1.442695, %v410_v23 }
 0x21f   :  { %v2496_v26 = vpop.eup %2495  ;;  %2497 = vpow2.f32 %v2346_v24 }
 0x220   :  { %v183_v30 = vadd.f32 1.0, %v2496_v26  ;;  %2499 = vpow2.f32 %v2349_v25 }
 0x222   :  { %2501 = vrcp.f32 %v183_v30  ;;  %v315_v40 = vpop.f32.mrf.mxu1  ;;  %v195_v3 = vand.u32 2147483648, %v183_v30  ;;  %vm189_vm3 = vweird.f32 %v183_v30  ;;  %v193_v5 = vand.u32 2147483647, %v183_v30 }
 0x224   :  { %v341_v43 = vpop.f32.mrf.mxu3  ;;  %v196_v19 = vor.u32 1.1754944e-38, %v195_v3  ;;  %vm194_vm6 = vcmp.eq.f32.partialorder %v193_v5, 8.507059e+37 }
 0x225   :  { %v2498_v32 = vpop.eup %2497  ;;  %v342_v51 = vadd.f32 %v341_v43, %v315_v40 }
 0x226   :  { %v2500_v33 = vpop.eup %2499  ;;  %v270_v34 = vadd.f32 1.0, %v2498_v32 }
 0x227   :  { %v414_v37 = vadd.f32 1.0, %v2500_v33  ;;  %v347_v57 = vadd.f32 %v3057_v54, %v342_v51 }
 0x228   :  { %v2502_v46 = vpop.eup %2501  ;;  %2503 = vrcp.f32 %v270_v34  ;;  %v282_v12 = vand.u32 2147483648, %v270_v34  ;;  %v280_v18 = vand.u32 2147483647, %v270_v34  ;;  %vm276_vm7 = vweird.f32 %v270_v34 }
 0x229   :  { %v185_v49 = vmul.f32 %v2502_v46, %v183_v30  ;;  %2505 = vrcp.f32 %v414_v37  ;;  %vm190_vm2 = vweird.f32 %v2502_v46  ;;  %vm420_vm11 = vweird.f32 %v414_v37 }
 0x22a   :  { %vm191_vm4 = vmor %vm189_vm3, %vm190_vm2  ;;  %2507 = vtanh.f32 %v347_v57  ;;  %v283_v24 = vor.u32 1.1754944e-38, %v282_v12  ;;  %vm281_vm9 = vcmp.eq.f32.partialorder %v280_v18, 8.507059e+37 }
 0x22b   :  { %v186_v52 = vsub.f32 1.0, %v185_v49  ;;  %v426_v49 = vand.u32 2147483648, %v414_v37 }
 0x22d   :  { %v187_v55 = vmul.f32 %v2502_v46, %v186_v52  ;;  %v427_v52 = vor.u32 1.1754944e-38, %v426_v49 }
 0x22e   :  { %v2504_v56 = vpop.eup %2503 }
 0x22f   :  { %v2506_v58 = vpop.eup %2505  ;;  %v188_v59 = vadd.f32 %v2502_v46, %v187_v55  ;;  %v272_v2 = vmul.f32 %v2504_v56, %v270_v34  ;;  %vm277_vm5 = vweird.f32 %v2504_v56  ;;  %v424_v34 = vand.u32 2147483647, %v414_v37 }
 0x230   :  { %v416_v4 = vmul.f32 %v2506_v58, %v414_v37  ;;  %vm278_vm8 = vmor %vm276_vm7, %vm277_vm5  ;;  %v2508_v26 = vpop.eup %2507  ;;  %vm421_vm10 = vweird.f32 %v2506_v58 }
 0x231   :  { %v273_v11 = vsub.f32 1.0, %v272_v2  ;;  %v192_v15 = vsel %vm191_vm4, %v2502_v46, %v188_v59  ;;  %vm422_vm12 = vmor %vm420_vm11, %vm421_vm10  ;;  %vm425_vm13 = vcmp.eq.f32.partialorder %v424_v34, 8.507059e+37 }
 0x232   :  { %v417_v21 = vsub.f32 1.0, %v416_v4  ;;  %v197_v23 = vsel %vm194_vm6, %v196_v19, %v192_v15 }
 0x233   :  { %v274_v16 = vmul.f32 %v2504_v56, %v273_v11  ;;  %v431_v33 = vmul.f32 %v2508_v26, %v197_v23 }
 0x234   :  { %v418_v32 = vmul.f32 %v2506_v58, %v417_v21 }
 0x235   :  { %v275_v22 = vadd.f32 %v2504_v56, %v274_v16 }
 0x236   :  { %v419_v46 = vadd.f32 %v2506_v58, %v418_v32 }
 0x237   :  { %v279_v25 = vsel %vm278_vm8, %v2504_v56, %v275_v22 }
 0x238   :  { %v284_v30 = vsel %vm281_vm9, %v283_v24, %v279_v25  ;;  %v423_v51 = vsel %vm422_vm12, %v2506_v58, %v419_v46 }
 0x239   :  { %v430_v40 = vmul.f32 0.0, %v284_v30  ;;  %v428_v56 = vsel %vm425_vm13, %v427_v52, %v423_v51 }
 0x23b   :  { %v3060_v43 = vadd.f32 %v431_v33, %v430_v40 }
 0x23d   :  { %2509 = vtanh.f32 %v3060_v43  ;;  %v438_v2 = vmul.f32 %v2900_v1, %v3060_v43 }
 0x243   :  { %v2510_v55 = vpop.eup %2509 }
 0x244   :  { %v434_v57 = vmul.f32 %v2510_v55, %v428_v56 }
 0x246   :  { %2350 = vmatmul.msk.f32.vlgmr.msra.gmra.mxu1 %vm112_vm0, %v434_v57  ;;  %436 = vst.msk [vmem:[#allocation11] sm:$0xff] %vm112_vm0, %v434_v57  ;;  %2353 = vmatmul.msk.f32.vlgmr.msra.gmra.mxu0 %vm112_vm0, %v434_v57  ;;  %v437_v59 = vmul.f32 %v2895_v0, %v434_v57 }
 0x247   :  { %809 = vmatpush.msra.mxu0 %v2949_v29  ;;  %746 = vmatpush.msra.mxu1 %v2907_v7 }
 0x248   :  { %v439_v37 = vadd.f32 %v438_v2, %v437_v59 }
 0x249   :  { %810 = vmatpush.msra.mxu0 %v2947_v28  ;;  %747 = vmatpush.msra.mxu1 %v2913_v9 }
 0x24a   :  { %v440_v58 = vsel %vm112_vm0, %v439_v37, 0.0 }
 0x24b   :  { %811 = vmatpush.msra.mxu0 %v2954_v31  ;;  %748 = vmatpush.msra.mxu1 %v2911_v8 }
 0x24c   :  { %441 = vadd.xlane.f32.xlu2 %v440_v58 }
 0x24d   :  { %812 = vmatpush.msra.mxu0 %v2963_v36  ;;  %749 = vmatpush.msra.mxu1 %v2925_v13 }
 0x24e   :  { %2356 = vmatmul.msk.f32.vlgmr.msrb.gmra.mxu1 %vm112_vm0, %v434_v57  ;;  %2358 = vmatmul.msk.f32.vlgmr.msrb.gmra.mxu0 %vm112_vm0, %v434_v57 }
 0x24f   :  { %869 = vmatpush.msrb.mxu1 %v2998_v47  ;;  %911 = vmatpush.msrb.mxu0 %v2968_v38 }
 0x251   :  { %870 = vmatpush.msrb.mxu1 %v3024_v60  ;;  %912 = vmatpush.msrb.mxu0 %v2974_v41 }
 0x253   :  { %871 = vmatpush.msrb.mxu1 %v3028_v62  ;;  %913 = vmatpush.msrb.mxu0 %v2984_v45 }
 0x255   :  { %872 = vmatpush.msrb.mxu1 %v3030_v63  ;;  %914 = vmatpush.msrb.mxu0 %v2982_v44 }
 0x264   :  { %451 = vrot.lane.b32.xlu2 %v3015_v53, %s2829_s10 }
 0x2bf   :  { %v442_v3 = vpop.xlane.xlu2 %441 }
 0x2c0   :  { %v443_v4 = vadd.f32 %v442_v3, %v2928_v14 }
 0x2c2   :  { %v444_v5 = vsel %vm117_vm1, %v443_v4, -inf }
 0x2c3   :  { %445 = vmax.xlane.f32.xlu1 %v444_v5  ;;  %v546_v32 = vpop.f32.mrf.mxu0  ;;  %v483_v33 = vpop.f32.mrf.mxu1 }
 0x2c7   :  { %v452_v23 = vpop.permute.xlu2 %451 }
 0x2cb   :  { %v648_v57 = vpop.f32.mrf.mxu0 }
 0x336   :  { %v446_v11 = vpop.xlane.xlu1 %445 }
 0x337   :  { %v447_v12 = vsub.f32 %v443_v4, %v446_v11 }
 0x339   :  { %v448_v15 = vmul.f32 1.442695, %v447_v12 }
 0x33b   :  { %2511 = vpow2.f32 %v448_v15  ;;  %v606_v15 = vpop.f32.mrf.mxu1 }
 0x341   :  { %v2512_v16 = vpop.eup %2511 }
 0x342   :  { %v455_v18 = vsel %vm117_vm1, %v2512_v16, 0.0  ;;  %v454_v25 = vmul.f32 %v2512_v16, %v452_v23 }
 0x343   :  { %456 = vadd.xlane.f32.xlu0 %v455_v18 }
 0x3b6   :  { %v457_v19 = vpop.xlane.xlu0 %456 }
 0x3b7   :  { %2513 = vrcp.f32 %v457_v19 }
 0x3bd   :  { %v2514_v21 = vpop.eup %2513 }
 0x3be   :  { %v459_v22 = vmul.f32 %v2514_v21, %v457_v19 }
 0x3c0   :  { %v460_v24 = vsub.f32 2.0, %v459_v22 }
 0x3c2   :  { %v461_v26 = vmul.f32 %v2514_v21, %v460_v24 }
 0x3c4   :  { %v3093_v30 = vmul.f32 %v461_v26, %v454_v25 }
 0x3c6   :  { %2351 = vmatmul.msk.f32.vlgmr.msra.gmra.mxu3 %vm117_vm1, %v3093_v30  ;;  %2354 = vmatmul.msk.f32.vlgmr.msra.gmra.mxu2 %vm117_vm1, %v3093_v30 }
 0x3c7   :  { %831 = vmatpush.msra.mxu2 %v2945_v27  ;;  %771 = vmatpush.msra.mxu3 %v2905_v6 }
 0x3c9   :  { %832 = vmatpush.msra.mxu2 %v2961_v35  ;;  %772 = vmatpush.msra.mxu3 %v2915_v10 }
 0x3ce   :  { %2357 = vmatmul.msk.f32.vlgmr.msrb.gmra.mxu3 %vm117_vm1, %v3093_v30  ;;  %2359 = vmatmul.msk.f32.vlgmr.msrb.gmra.mxu2 %vm117_vm1, %v3093_v30 }
 0x3cf   :  { %891 = vmatpush.msrb.mxu3 %v3000_v48  ;;  %933 = vmatpush.msrb.mxu2 %v2970_v39 }
 0x3d1   :  { %892 = vmatpush.msrb.mxu3 %v3026_v61  ;;  %934 = vmatpush.msrb.mxu2 %v2976_v42 }
 0x449   :  { %v506_v40 = vpop.f32.mrf.mxu3  ;;  %v566_v46 = vpop.f32.mrf.mxu2 }
 0x44a   :  { %v507_v49 = vadd.f32 %v506_v40, %v483_v33  ;;  %v567_v34 = vadd.f32 %v566_v46, %v546_v32 }
 0x44c   :  { %v509_v51 = vadd.f32 %v3007_v50, %v507_v49  ;;  %v569_v52 = vadd.f32 %v567_v34, %v3051_v17 }
 0x44e   :  { %v2352_v55 = vmul.f32 -1.442695, %v509_v51  ;;  %v2355_v56 = vmul.f32 -1.442695, %v569_v52 }
 0x450   :  { %2515 = vpow2.f32 %v2352_v55 }
 0x451   :  { %2517 = vpow2.f32 %v2355_v56  ;;  %v668_v59 = vpop.f32.mrf.mxu2  ;;  %v626_v12 = vpop.f32.mrf.mxu3 }
 0x452   :  { %v669_v2 = vadd.f32 %v668_v59, %v648_v57  ;;  %v627_v16 = vadd.f32 %v626_v12, %v606_v15 }
 0x454   :  { %v671_v37 = vadd.f32 %v669_v2, %v3053_v20  ;;  %v629_v21 = vadd.f32 %v627_v16, %v3057_v54 }
 0x456   :  { %v2516_v58 = vpop.eup %2515  ;;  %v2360_v3 = vmul.f32 -1.442695, %v671_v37 }
 0x457   :  { %v2518_v4 = vpop.eup %2517  ;;  %v513_v5 = vadd.f32 1.0, %v2516_v58 }
 0x458   :  { %v573_v11 = vadd.f32 1.0, %v2518_v4  ;;  %2519 = vpow2.f32 %v2360_v3 }
 0x459   :  { %2521 = vrcp.f32 %v513_v5  ;;  %v525_v33 = vand.u32 2147483648, %v513_v5  ;;  %v523_v49 = vand.u32 2147483647, %v513_v5  ;;  %vm519_vm2 = vweird.f32 %v513_v5 }
 0x45a   :  { %2523 = vrcp.f32 %v573_v11  ;;  %v585_v40 = vand.u32 2147483648, %v573_v11  ;;  %v583_v51 = vand.u32 2147483647, %v573_v11  ;;  %vm579_vm3 = vweird.f32 %v573_v11 }
 0x45b   :  { %v526_v56 = vor.u32 1.1754944e-38, %v525_v33  ;;  %vm524_vm6 = vcmp.eq.f32.partialorder %v523_v49, 8.507059e+37 }
 0x45c   :  { %v586_v59 = vor.u32 1.1754944e-38, %v585_v40  ;;  %vm584_vm7 = vcmp.eq.f32.partialorder %v583_v51, 8.507059e+37 }
 0x45e   :  { %v2520_v18 = vpop.eup %2519 }
 0x45f   :  { %v2522_v19 = vpop.eup %2521  ;;  %v675_v22 = vadd.f32 1.0, %v2520_v18 }
 0x460   :  { %v2524_v23 = vpop.eup %2523  ;;  %v515_v24 = vmul.f32 %v2522_v19, %v513_v5  ;;  %vm520_vm14 = vweird.f32 %v2522_v19 }
 0x461   :  { %v575_v25 = vmul.f32 %v2524_v23, %v573_v11  ;;  %2525 = vrcp.f32 %v675_v22  ;;  %vm580_vm15 = vweird.f32 %v2524_v23  ;;  %vm521_vm4 = vmor %vm519_vm2, %vm520_vm14  ;;  %vm681_vm9 = vweird.f32 %v675_v22 }
 0x462   :  { %v516_v26 = vsub.f32 1.0, %v515_v24  ;;  %2527 = vtanh.f32 %v629_v21  ;;  %vm581_vm5 = vmor %vm579_vm3, %vm580_vm15  ;;  %v687_v24 = vand.u32 2147483648, %v675_v22 }
 0x463   :  { %v576_v32 = vsub.f32 1.0, %v575_v25 }
 0x464   :  { %v517_v46 = vmul.f32 %v2522_v19, %v516_v26  ;;  %v688_v26 = vor.u32 1.1754944e-38, %v687_v24 }
 0x465   :  { %v577_v34 = vmul.f32 %v2524_v23, %v576_v32 }
 0x466   :  { %v518_v52 = vadd.f32 %v2522_v19, %v517_v46 }
 0x467   :  { %v2526_v55 = vpop.eup %2525  ;;  %v578_v57 = vadd.f32 %v2524_v23, %v577_v34 }
 0x468   :  { %v522_v2 = vsel %vm521_vm4, %v2522_v19, %v518_v52  ;;  %v677_v37 = vmul.f32 %v2526_v55, %v675_v22  ;;  %v2528_v58 = vpop.eup %2527  ;;  %vm682_vm8 = vweird.f32 %v2526_v55  ;;  %v685_v19 = vand.u32 2147483647, %v675_v22 }
 0x469   :  { %v527_v3 = vsel %vm524_vm6, %v526_v56, %v522_v2  ;;  %v582_v4 = vsel %vm581_vm5, %v2524_v23, %v578_v57  ;;  %vm683_vm10 = vmor %vm681_vm9, %vm682_vm8 }
 0x46a   :  { %v587_v12 = vsel %vm584_vm7, %v586_v59, %v582_v4  ;;  %v692_v15 = vmul.f32 %v2528_v58, %v527_v3  ;;  %v678_v16 = vsub.f32 1.0, %v677_v37  ;;  %vm686_vm11 = vcmp.eq.f32.partialorder %v685_v19, 8.507059e+37 }
 0x46b   :  { %v691_v18 = vmul.f32 %v587_v12, %v3060_v43 }
 0x46c   :  { %v679_v5 = vmul.f32 %v2526_v55, %v678_v16 }
 0x46d   :  { %v3116_v21 = vadd.f32 %v692_v15, %v691_v18 }
 0x46e   :  { %v680_v11 = vadd.f32 %v2526_v55, %v679_v5 }
 0x46f   :  { %2529 = vtanh.f32 %v3116_v21  ;;  %v708_v22 = vmul.f32 %v2900_v1, %v3116_v21 }
 0x470   :  { %v684_v25 = vsel %vm683_vm10, %v2526_v55, %v680_v11 }
 0x471   :  { %v689_v32 = vsel %vm686_vm11, %v688_v26, %v684_v25 }
 0x475   :  { %v2530_v23 = vpop.eup %2529 }
 0x476   :  { %v3119_v33 = vmul.f32 %v2530_v23, %v689_v32 }
 0x478   :  { %2361 = vmatmul.msk.f32.vlgmr.msra.gmra.mxu1 %vm112_vm0, %v3119_v33  ;;  %2364 = vmatmul.msk.f32.vlgmr.msra.gmra.mxu0 %vm112_vm0, %v3119_v33  ;;  %v707_v43 = vmul.f32 %v2895_v0, %v3119_v33 }
 0x479   :  { %1077 = vmatpush.msra.mxu0 %v2949_v29  ;;  %1014 = vmatpush.msra.mxu1 %v2907_v7 }
 0x47a   :  { %v709_v40 = vadd.f32 %v708_v22, %v707_v43 }
 0x47b   :  { %1078 = vmatpush.msra.mxu0 %v2947_v28  ;;  %1015 = vmatpush.msra.mxu1 %v2913_v9 }
 0x47c   :  { %v710_v46 = vsel %vm112_vm0, %v709_v40, 0.0 }
 0x47d   :  { %1079 = vmatpush.msra.mxu0 %v2954_v31  ;;  %1016 = vmatpush.msra.mxu1 %v2911_v8 }
 0x47e   :  { %711 = vadd.xlane.f32.xlu1 %v710_v46 }
 0x47f   :  { %1080 = vmatpush.msra.mxu0 %v2963_v36  ;;  %1017 = vmatpush.msra.mxu1 %v2925_v13 }
 0x480   :  { %2367 = vmatmul.msk.f32.vlgmr.msrb.gmra.mxu1 %vm112_vm0, %v3119_v33  ;;  %2369 = vmatmul.msk.f32.vlgmr.msrb.gmra.mxu0 %vm112_vm0, %v3119_v33 }
 0x481   :  { %1137 = vmatpush.msrb.mxu1 %v2998_v47  ;;  %1179 = vmatpush.msrb.mxu0 %v2968_v38 }
 0x483   :  { %1138 = vmatpush.msrb.mxu1 %v3024_v60  ;;  %1180 = vmatpush.msrb.mxu0 %v2974_v41 }
 0x485   :  { %1139 = vmatpush.msrb.mxu1 %v3028_v62  ;;  %1181 = vmatpush.msrb.mxu0 %v2984_v45 }
 0x487   :  { %1140 = vmatpush.msrb.mxu1 %v3030_v63  ;;  %1182 = vmatpush.msrb.mxu0 %v2982_v44 }
 0x4f1   :  { %v712_v0 = vpop.xlane.xlu1 %711 }
 0x4f2   :  { %v713_v1 = vadd.f32 %v712_v0, %v2928_v14 }
 0x4f4   :  { %v714_v49 = vsel %vm117_vm1, %v713_v1, -inf }
 0x4f5   :  { %715 = vmax.xlane.f32.xlu0 %v714_v49  ;;  %v814_v12 = vpop.f32.mrf.mxu0 }
 0x4fd   :  { %v916_v25 = vpop.f32.mrf.mxu0 }
 0x509   :  { %720 = vrot.lane.b32.xlu0 %v3015_v53, %s2825_s27 }
 0x511   :  { %988 = vrot.lane.b32.xlu0 %v3015_v53, %s2830_s15 }
 0x568   :  { %v716_v34 = vpop.xlane.xlu0 %715 }
 0x569   :  { %v717_v51 = vsub.f32 %v713_v1, %v716_v34 }
 0x56b   :  { %v718_v52 = vmul.f32 1.442695, %v717_v51 }
 0x56d   :  { %2531 = vpow2.f32 %v718_v52 }
 0x573   :  { %v2532_v55 = vpop.eup %2531 }
 0x574   :  { %v724_v56 = vsel %vm117_vm1, %v2532_v55, 0.0 }
 0x575   :  { %725 = vadd.xlane.f32.xlu1 %v724_v56 }
 0x57b   :  { %v721_v37 = vpop.permute.xlu0 %720 }
 0x57c   :  { %v723_v58 = vmul.f32 %v2532_v55, %v721_v37 }
 0x5e8   :  { %v726_v57 = vpop.xlane.xlu1 %725 }
 0x5e9   :  { %2533 = vrcp.f32 %v726_v57 }
 0x5ef   :  { %v2534_v59 = vpop.eup %2533 }
 0x5f0   :  { %v728_v2 = vmul.f32 %v2534_v59, %v726_v57 }
 0x5f2   :  { %v729_v14 = vsub.f32 2.0, %v728_v2 }
 0x5f4   :  { %v730_v3 = vmul.f32 %v2534_v59, %v729_v14 }
 0x5f6   :  { %v3155_v4 = vmul.f32 %v730_v3, %v723_v58 }
 0x5f8   :  { %2362 = vmatmul.msk.f32.vlgmr.msra.gmra.mxu3 %vm117_vm1, %v3155_v4  ;;  %2365 = vmatmul.msk.f32.vlgmr.msra.gmra.mxu2 %vm117_vm1, %v3155_v4 }
 0x5f9   :  { %1099 = vmatpush.msra.mxu2 %v2945_v27  ;;  %1039 = vmatpush.msra.mxu3 %v2905_v6  ;;  %v751_v6 = vpop.f32.mrf.mxu1 }
 0x5fb   :  { %1100 = vmatpush.msra.mxu2 %v2961_v35  ;;  %1040 = vmatpush.msra.mxu3 %v2915_v10 }
 0x600   :  { %2368 = vmatmul.msk.f32.vlgmr.msrb.gmra.mxu3 %vm117_vm1, %v3155_v4  ;;  %2370 = vmatmul.msk.f32.vlgmr.msrb.gmra.mxu2 %vm117_vm1, %v3155_v4 }
 0x601   :  { %1159 = vmatpush.msrb.mxu3 %v3000_v48  ;;  %1201 = vmatpush.msrb.mxu2 %v2970_v39  ;;  %v874_v49 = vpop.f32.mrf.mxu1 }
 0x603   :  { %1160 = vmatpush.msrb.mxu3 %v3026_v61  ;;  %1202 = vmatpush.msrb.mxu2 %v2976_v42 }
 0x67b   :  { %v774_v15 = vpop.f32.mrf.mxu3  ;;  %v834_v16 = vpop.f32.mrf.mxu2 }
 0x67c   :  { %v775_v18 = vadd.f32 %v774_v15, %v751_v6  ;;  %v835_v10 = vadd.f32 %v834_v16, %v814_v12 }
 0x67e   :  { %v777_v5 = vadd.f32 %v3007_v50, %v775_v18  ;;  %v837_v11 = vadd.f32 %v835_v10, %v3051_v17 }
 0x680   :  { %v2363_v24 = vmul.f32 -1.442695, %v777_v5  ;;  %v2366_v19 = vmul.f32 -1.442695, %v837_v11 }
 0x682   :  { %2535 = vpow2.f32 %v2363_v24 }
 0x683   :  { %2537 = vpow2.f32 %v2366_v19  ;;  %v936_v26 = vpop.f32.mrf.mxu2  ;;  %v894_v1 = vpop.f32.mrf.mxu3 }
 0x684   :  { %v937_v23 = vadd.f32 %v936_v26, %v916_v25  ;;  %v895_v34 = vadd.f32 %v894_v1, %v874_v49 }
 0x686   :  { %v939_v32 = vadd.f32 %v937_v23, %v3053_v20  ;;  %v897_v55 = vadd.f32 %v895_v34, %v3057_v54 }
 0x688   :  { %v2536_v43 = vpop.eup %2535  ;;  %v2371_v22 = vmul.f32 -1.442695, %v939_v32 }
 0x689   :  { %v2538_v40 = vpop.eup %2537  ;;  %v781_v46 = vadd.f32 1.0, %v2536_v43 }
 0x68a   :  { %v841_v0 = vadd.f32 1.0, %v2538_v40  ;;  %2539 = vpow2.f32 %v2371_v22 }
 0x68b   :  { %2541 = vrcp.f32 %v781_v46  ;;  %v793_v58 = vand.u32 2147483648, %v781_v46  ;;  %v791_v6 = vand.u32 2147483647, %v781_v46  ;;  %vm787_vm14 = vweird.f32 %v781_v46 }
 0x68c   :  { %2543 = vrcp.f32 %v841_v0  ;;  %v853_v3 = vand.u32 2147483648, %v841_v0  ;;  %v851_v16 = vand.u32 2147483647, %v841_v0  ;;  %vm847_vm15 = vweird.f32 %v841_v0 }
 0x68d   :  { %v794_v5 = vor.u32 1.1754944e-38, %v793_v58  ;;  %vm792_vm4 = vcmp.eq.f32.partialorder %v791_v6, 8.507059e+37 }
 0x68e   :  { %v854_v24 = vor.u32 1.1754944e-38, %v853_v3  ;;  %vm852_vm5 = vcmp.eq.f32.partialorder %v851_v16, 8.507059e+37 }
 0x690   :  { %v2540_v51 = vpop.eup %2539 }
 0x691   :  { %v2542_v52 = vpop.eup %2541  ;;  %v943_v56 = vadd.f32 1.0, %v2540_v51 }
 0x692   :  { %v2544_v57 = vpop.eup %2543  ;;  %v783_v59 = vmul.f32 %v2542_v52, %v781_v46  ;;  %vm788_vm12 = vweird.f32 %v2542_v52 }
 0x693   :  { %v843_v2 = vmul.f32 %v2544_v57, %v841_v0  ;;  %2545 = vrcp.f32 %v943_v56  ;;  %vm848_vm13 = vweird.f32 %v2544_v57  ;;  %vm789_vm2 = vmor %vm787_vm14, %vm788_vm12  ;;  %v955_v34 = vand.u32 2147483648, %v943_v56 }
 0x694   :  { %v784_v37 = vsub.f32 1.0, %v783_v59  ;;  %2547 = vtanh.f32 %v897_v55  ;;  %vm849_vm3 = vmor %vm847_vm15, %vm848_vm13  ;;  %vm949_vm7 = vweird.f32 %v943_v56  ;;  %v953_v51 = vand.u32 2147483647, %v943_v56 }
 0x695   :  { %v844_v14 = vsub.f32 1.0, %v843_v2  ;;  %v956_v55 = vor.u32 1.1754944e-38, %v955_v34 }
 0x696   :  { %v785_v12 = vmul.f32 %v2542_v52, %v784_v37  ;;  %vm954_vm9 = vcmp.eq.f32.partialorder %v953_v51, 8.507059e+37  ;;  %v3197_v37 = vld [vmem:[%s3518_s6] ss:$0 sm:$0xff] }
 0x697   :  { %v845_v15 = vmul.f32 %v2544_v57, %v844_v14 }
 0x698   :  { %v786_v18 = vadd.f32 %v2542_v52, %v785_v12 }
 0x699   :  { %v2546_v10 = vpop.eup %2545  ;;  %v846_v11 = vadd.f32 %v2544_v57, %v845_v15 }
 0x69a   :  { %v790_v19 = vsel %vm789_vm2, %v2542_v52, %v786_v18  ;;  %v945_v25 = vmul.f32 %v2546_v10, %v943_v56  ;;  %v2548_v26 = vpop.eup %2547  ;;  %vm950_vm6 = vweird.f32 %v2546_v10 }
 0x69b   :  { %v795_v23 = vsel %vm792_vm4, %v794_v5, %v790_v19  ;;  %v850_v32 = vsel %vm849_vm3, %v2544_v57, %v846_v11  ;;  %vm951_vm8 = vmor %vm949_vm7, %vm950_vm6  ;;  %v989_v11 = vpop.permute.xlu0 %988 }
 0x69c   :  { %v855_v43 = vsel %vm852_vm5, %v854_v24, %v850_v32  ;;  %v960_v22 = vmul.f32 %v2548_v26, %v795_v23  ;;  %v946_v40 = vsub.f32 1.0, %v945_v25  ;;  %v3236_v23 = vld [vmem:[#allocation7 + $0x8] sm:$0xff]  ;;  %v3240_v32 = vld [vmem:[#allocation7] sm:$0xff] }
 0x69d   :  { %v959_v1 = vmul.f32 %v855_v43, %v3116_v21  ;;  %v3190_v21 = vld [vmem:[%s3517_s5] ss:$0 sm:$0xff] }
 0x69e   :  { %v947_v46 = vmul.f32 %v2546_v10, %v946_v40 }
 0x69f   :  { %v3178_v49 = vadd.f32 %v960_v22, %v959_v1 }
 0x6a0   :  { %v948_v0 = vadd.f32 %v2546_v10, %v947_v46 }
 0x6a1   :  { %2549 = vtanh.f32 %v3178_v49  ;;  %v976_v14 = vmul.f32 %v3197_v37, %v3178_v49 }
 0x6a2   :  { %v952_v52 = vsel %vm951_vm8, %v2546_v10, %v948_v0 }
 0x6a3   :  { %v957_v59 = vsel %vm954_vm9, %v956_v55, %v952_v52 }
 0x6a7   :  { %v2550_v57 = vpop.eup %2549 }
 0x6a8   :  { %v3181_v2 = vmul.f32 %v2550_v57, %v957_v59 }
 0x6aa   :  { %2372 = vmatmul.msk.f32.vlgmr.msra.gmra.mxu1 %vm112_vm0, %v3181_v2  ;;  %2375 = vmatmul.msk.f32.vlgmr.msra.gmra.mxu0 %vm112_vm0, %v3181_v2  ;;  %v975_v56 = vmul.f32 %v3190_v21, %v3181_v2 }
 0x6ab   :  { %1345 = vmatpush.msra.mxu0 %v2949_v29  ;;  %1282 = vmatpush.msra.mxu1 %v2907_v7 }
 0x6ac   :  { %v977_v58 = vadd.f32 %v976_v14, %v975_v56 }
 0x6ad   :  { %1346 = vmatpush.msra.mxu0 %v2947_v28  ;;  %1283 = vmatpush.msra.mxu1 %v2913_v9 }
 0x6ae   :  { %v978_v3 = vsel %vm112_vm0, %v977_v58, 0.0 }
 0x6af   :  { %1347 = vmatpush.msra.mxu0 %v2954_v31  ;;  %1284 = vmatpush.msra.mxu1 %v2911_v8  ;;  %v3224_v8 = vld [vmem:[#allocation5] sm:$0xff] }
 0x6b0   :  { %979 = vadd.xlane.f32.xlu1 %v978_v3 }
 0x6b1   :  { %1348 = vmatpush.msra.mxu0 %v2963_v36  ;;  %1285 = vmatpush.msra.mxu1 %v2925_v13 }
 0x6b2   :  { %2378 = vmatmul.msk.f32.vlgmr.msrb.gmra.mxu1 %vm112_vm0, %v3181_v2  ;;  %2380 = vmatmul.msk.f32.vlgmr.msrb.gmra.mxu0 %vm112_vm0, %v3181_v2 }
 0x6b3   :  { %1405 = vmatpush.msrb.mxu1 %v2998_v47  ;;  %1447 = vmatpush.msrb.mxu0 %v2968_v38 }
 0x6b5   :  { %1406 = vmatpush.msrb.mxu1 %v3024_v60  ;;  %1448 = vmatpush.msrb.mxu0 %v2974_v41 }
 0x6b7   :  { %1407 = vmatpush.msrb.mxu1 %v3028_v62  ;;  %1449 = vmatpush.msrb.mxu0 %v2984_v45 }
 0x6b9   :  { %1408 = vmatpush.msrb.mxu1 %v3030_v63  ;;  %1450 = vmatpush.msrb.mxu0 %v2982_v44 }
 0x723   :  { %v980_v7 = vpop.xlane.xlu1 %979 }
 0x724   :  { %v981_v9 = vadd.f32 %v3224_v8, %v980_v7 }
 0x726   :  { %v982_v13 = vsel %vm117_vm1, %v981_v9, -inf }
 0x727   :  { %983 = vmax.xlane.f32.xlu2 %v982_v13  ;;  %v1082_v43 = vpop.f32.mrf.mxu0  ;;  %v1019_v22 = vpop.f32.mrf.mxu1 }
 0x72f   :  { %v1184_v57 = vpop.f32.mrf.mxu0 }
 0x79a   :  { %v984_v53 = vpop.xlane.xlu2 %983 }
 0x79b   :  { %v985_v12 = vsub.f32 %v981_v9, %v984_v53 }
 0x79d   :  { %v986_v6 = vmul.f32 1.442695, %v985_v12 }
 0x79f   :  { %2551 = vpow2.f32 %v986_v6 }
 0x7a5   :  { %v2552_v15 = vpop.eup %2551 }
 0x7a6   :  { %v992_v16 = vsel %vm117_vm1, %v2552_v15, 0.0  ;;  %v991_v19 = vmul.f32 %v2552_v15, %v989_v11 }
 0x7a7   :  { %993 = vadd.xlane.f32.xlu1 %v992_v16 }
 0x81a   :  { %v994_v18 = vpop.xlane.xlu1 %993 }
 0x81b   :  { %2553 = vrcp.f32 %v994_v18 }
 0x821   :  { %v2554_v10 = vpop.eup %2553 }
 0x822   :  { %v996_v5 = vmul.f32 %v2554_v10, %v994_v18 }
 0x824   :  { %v997_v24 = vsub.f32 2.0, %v996_v5 }
 0x826   :  { %v998_v25 = vmul.f32 %v2554_v10, %v997_v24 }
 0x828   :  { %v3229_v26 = vmul.f32 %v998_v25, %v991_v19 }
 0x82a   :  { %3522 = vst [vmem:[#allocation18_spill] sm:$0xff] %v3229_v26  ;;  %2373 = vmatmul.msk.f32.vlgmr.msra.gmra.mxu3 %vm117_vm1, %v3229_v26  ;;  %2376 = vmatmul.msk.f32.vlgmr.msra.gmra.mxu2 %vm117_vm1, %v3229_v26 }
 0x82b   :  { %1367 = vmatpush.msra.mxu2 %v2945_v27  ;;  %1307 = vmatpush.msra.mxu3 %v3236_v23 }
 0x82d   :  { %1368 = vmatpush.msra.mxu2 %v2961_v35  ;;  %1308 = vmatpush.msra.mxu3 %v3240_v32 }
 0x832   :  { %2379 = vmatmul.msk.f32.vlgmr.msrb.gmra.mxu3 %vm117_vm1, %v3229_v26  ;;  %2381 = vmatmul.msk.f32.vlgmr.msrb.gmra.mxu2 %vm117_vm1, %v3229_v26 }
 0x833   :  { %1427 = vmatpush.msrb.mxu3 %v3000_v48  ;;  %1469 = vmatpush.msrb.mxu2 %v2970_v39 }
 0x835   :  { %1428 = vmatpush.msrb.mxu3 %v3026_v61  ;;  %1470 = vmatpush.msrb.mxu2 %v2976_v42 }
 0x8ad   :  { %v1042_v40 = vpop.f32.mrf.mxu3  ;;  %v1102_v1 = vpop.f32.mrf.mxu2 }
 0x8ae   :  { %v1043_v46 = vadd.f32 %v1042_v40, %v1019_v22  ;;  %v1103_v0 = vadd.f32 %v1102_v1, %v1082_v43 }
 0x8b0   :  { %v1045_v34 = vadd.f32 %v3007_v50, %v1043_v46  ;;  %v1105_v51 = vadd.f32 %v1103_v0, %v3051_v17  ;;  %v1142_v50 = vpop.f32.mrf.mxu1 }
 0x8b2   :  { %v2374_v52 = vmul.f32 -1.442695, %v1045_v34  ;;  %v2377_v55 = vmul.f32 -1.442695, %v1105_v51 }
 0x8b4   :  { %2555 = vpow2.f32 %v2374_v52 }
 0x8b5   :  { %2557 = vpow2.f32 %v2377_v55  ;;  %v1204_v59 = vpop.f32.mrf.mxu2  ;;  %v1162_v53 = vpop.f32.mrf.mxu3 }
 0x8b6   :  { %v1205_v56 = vadd.f32 %v1204_v59, %v1184_v57  ;;  %v1163_v12 = vadd.f32 %v1162_v53, %v1142_v50 }
 0x8b8   :  { %v1207_v14 = vadd.f32 %v1205_v56, %v3053_v20  ;;  %v1165_v16 = vadd.f32 %v1163_v12, %v3057_v54 }
 0x8ba   :  { %v2556_v58 = vpop.eup %2555  ;;  %v2382_v3 = vmul.f32 -1.442695, %v1207_v14 }
 0x8bb   :  { %v2558_v7 = vpop.eup %2557  ;;  %v1049_v9 = vadd.f32 1.0, %v2556_v58 }
 0x8bc   :  { %v1109_v13 = vadd.f32 1.0, %v2558_v7  ;;  %2559 = vpow2.f32 %v2382_v3 }
 0x8bd   :  { %2561 = vrcp.f32 %v1049_v9  ;;  %v1061_v25 = vand.u32 2147483648, %v1049_v9  ;;  %v1059_v40 = vand.u32 2147483647, %v1049_v9  ;;  %vm1055_vm12 = vweird.f32 %v1049_v9 }
 0x8be   :  { %2563 = vrcp.f32 %v1109_v13  ;;  %v1121_v43 = vand.u32 2147483648, %v1109_v13  ;;  %v1119_v46 = vand.u32 2147483647, %v1109_v13  ;;  %vm1115_vm13 = vweird.f32 %v1109_v13 }
 0x8bf   :  { %v1062_v51 = vor.u32 1.1754944e-38, %v1061_v25  ;;  %vm1060_vm2 = vcmp.eq.f32.partialorder %v1059_v40, 8.507059e+37  ;;  %v3279_v40 = vld [vmem:[#allocation8 + $0x8] sm:$0xff] }
 0x8c0   :  { %v1122_v55 = vor.u32 1.1754944e-38, %v1121_v43  ;;  %vm1120_vm3 = vcmp.eq.f32.partialorder %v1119_v46, 8.507059e+37  ;;  %v3274_v43 = vld [vmem:[#allocation8 + $0x10] sm:$0xff] }
 0x8c2   :  { %v2560_v6 = vpop.eup %2559 }
 0x8c3   :  { %v2562_v15 = vpop.eup %2561  ;;  %v1211_v18 = vadd.f32 1.0, %v2560_v6 }
 0x8c4   :  { %v2564_v10 = vpop.eup %2563  ;;  %v1051_v5 = vmul.f32 %v2562_v15, %v1049_v9  ;;  %vm1056_vm10 = vweird.f32 %v2562_v15 }
 0x8c5   :  { %v1111_v11 = vmul.f32 %v2564_v10, %v1109_v13  ;;  %2565 = vrcp.f32 %v1211_v18  ;;  %vm1116_vm11 = vweird.f32 %v2564_v10  ;;  %vm1057_vm14 = vmor %vm1055_vm12, %vm1056_vm10  ;;  %v1223_v6 = vand.u32 2147483648, %v1211_v18 }
 0x8c6   :  { %v1052_v24 = vsub.f32 1.0, %v1051_v5  ;;  %2567 = vtanh.f32 %v1165_v16  ;;  %vm1117_vm15 = vmor %vm1115_vm13, %vm1116_vm11  ;;  %vm1217_vm5 = vweird.f32 %v1211_v18 }
 0x8c7   :  { %v1112_v19 = vsub.f32 1.0, %v1111_v11  ;;  %v1224_v5 = vor.u32 1.1754944e-38, %v1223_v6 }
 0x8c8   :  { %v1053_v22 = vmul.f32 %v2562_v15, %v1052_v24 }
 0x8c9   :  { %v1113_v1 = vmul.f32 %v2564_v10, %v1112_v19  ;;  %v3270_v19 = vld [vmem:[#allocation8 + $0x18] sm:$0xff] }
 0x8ca   :  { %v1054_v0 = vadd.f32 %v2562_v15, %v1053_v22 }
 0x8cb   :  { %v2566_v34 = vpop.eup %2565  ;;  %v1114_v52 = vadd.f32 %v2564_v10, %v1113_v1  ;;  %v3283_v1 = vld [vmem:[#allocation8] sm:$0xff] }
 0x8cc   :  { %v1058_v57 = vsel %vm1057_vm14, %v2562_v15, %v1054_v0  ;;  %v1213_v59 = vmul.f32 %v2566_v34, %v1211_v18  ;;  %v2568_v56 = vpop.eup %2567  ;;  %vm1218_vm4 = vweird.f32 %v2566_v34  ;;  %v1221_v15 = vand.u32 2147483647, %v1211_v18 }
 0x8cd   :  { %v1063_v14 = vsel %vm1060_vm2, %v1062_v51, %v1058_v57  ;;  %v1118_v58 = vsel %vm1117_vm15, %v2564_v10, %v1114_v52  ;;  %vm1219_vm6 = vmor %vm1217_vm5, %vm1218_vm4 }
 0x8ce   :  { %v1123_v3 = vsel %vm1120_vm3, %v1122_v55, %v1118_v58  ;;  %v1228_v7 = vmul.f32 %v2568_v56, %v1063_v14  ;;  %v1214_v53 = vsub.f32 1.0, %v1213_v59  ;;  %vm1222_vm7 = vcmp.eq.f32.partialorder %v1221_v15, 8.507059e+37  ;;  %v3301_v56 = vld [vmem:[#allocation2] sm:$0xff] }
 0x8cf   :  { %v1227_v50 = vmul.f32 %v1123_v3, %v3178_v49 }
 0x8d0   :  { %v1215_v9 = vmul.f32 %v2566_v34, %v1214_v53 }
 0x8d1   :  { %v3256_v12 = vadd.f32 %v1228_v7, %v1227_v50 }
 0x8d2   :  { %v1216_v13 = vadd.f32 %v2566_v34, %v1215_v9 }
 0x8d3   :  { %2569 = vtanh.f32 %v3256_v12  ;;  %v1244_v18 = vmul.f32 %v3197_v37, %v3256_v12 }
 0x8d4   :  { %v1220_v16 = vsel %vm1219_vm6, %v2566_v34, %v1216_v13  ;;  %vm705_vm6 = vcmask 523520  }
 0x8d5   :  { %v1225_v11 = vsel %vm1222_vm7, %v1224_v5, %v1220_v16  ;;  %vm973_vm7 = vcmask 785920  }
 0x8d9   :  { %v2570_v10 = vpop.eup %2569 }
 0x8da   :  { %v3259_v24 = vmul.f32 %v2570_v10, %v1225_v11 }
 0x8dc   :  { %2383 = vmatmul.msk.f32.vlgmr.msra.gmra.mxu1 %vm112_vm0, %v3259_v24  ;;  %2386 = vmatmul.msk.f32.vlgmr.msra.gmra.mxu0 %vm112_vm0, %v3259_v24  ;;  %v1243_v49 = vmul.f32 %v3190_v21, %v3259_v24 }
 0x8dd   :  { %1609 = vmatpush.msra.mxu0 %v2949_v29  ;;  %1546 = vmatpush.msra.mxu1 %v3270_v19 }
 0x8de   :  { %v1245_v25 = vadd.f32 %v1244_v18, %v1243_v49  ;;  %v3326_v49 = vld [vmem:[%s3516_s4] ss:$0 sm:$0xff]  ;;  %s2831_s4 = smov 48  }
 0x8df   :  { %1610 = vmatpush.msra.mxu0 %v2947_v28  ;;  %1547 = vmatpush.msra.mxu1 %v3274_v43 }
 0x8e0   :  { %v1246_v22 = vsel %vm112_vm0, %v1245_v25, 0.0 }
 0x8e1   :  { %1611 = vmatpush.msra.mxu0 %v2954_v31  ;;  %1548 = vmatpush.msra.mxu1 %v3279_v40 }
 0x8e2   :  { %1247 = vadd.xlane.f32.xlu1 %v1246_v22 }
 0x8e3   :  { %1612 = vmatpush.msra.mxu0 %v2963_v36  ;;  %1549 = vmatpush.msra.mxu1 %v3283_v1 }
 0x8e4   :  { %2389 = vmatmul.msk.f32.vlgmr.msrb.gmra.mxu1 %vm112_vm0, %v3259_v24  ;;  %2391 = vmatmul.msk.f32.vlgmr.msrb.gmra.mxu0 %vm112_vm0, %v3259_v24 }
 0x8e5   :  { %1669 = vmatpush.msrb.mxu1 %v2998_v47  ;;  %1711 = vmatpush.msrb.mxu0 %v2968_v38 }
 0x8e7   :  { %1670 = vmatpush.msrb.mxu1 %v3024_v60  ;;  %1712 = vmatpush.msrb.mxu0 %v2974_v41 }
 0x8e9   :  { %1671 = vmatpush.msrb.mxu1 %v3028_v62  ;;  %1713 = vmatpush.msrb.mxu0 %v2984_v45 }
 0x8eb   :  { %1672 = vmatpush.msrb.mxu1 %v3030_v63  ;;  %1714 = vmatpush.msrb.mxu0 %v2982_v44 }
 0x955   :  { %v1248_v46 = vpop.xlane.xlu1 %1247 }
 0x956   :  { %v1249_v0 = vadd.f32 %v3224_v8, %v1248_v46 }
 0x958   :  { %v1250_v34 = vsel %vm117_vm1, %v1249_v0, -inf }
 0x959   :  { %1251 = vmax.xlane.f32.xlu0 %v1250_v34  ;;  %v1350_v6 = vpop.f32.mrf.mxu0  ;;  %v1287_v15 = vpop.f32.mrf.mxu1 }
 0x9cc   :  { %v1252_v51 = vpop.xlane.xlu0 %1251 }
 0x9cd   :  { %v1253_v52 = vsub.f32 %v1249_v0, %v1252_v51  ;;  %v1452_v0 = vpop.f32.mrf.mxu0 }
 0x9cf   :  { %v1254_v55 = vmul.f32 1.442695, %v1253_v52 }
 0x9d1   :  { %2571 = vpow2.f32 %v1254_v55 }
 0x9d7   :  { %v2572_v57 = vpop.eup %2571 }
 0x9d8   :  { %v1260_v59 = vsel %vm117_vm1, %v2572_v57, 0.0 }
 0x9d9   :  { %1261 = vadd.xlane.f32.xlu1 %v1260_v59 }
 0x9f2   :  { %1256 = vrot.lane.b32.xlu1 %v3301_v56, %s2828_s29 }
 0xa4c   :  { %v1262_v14 = vpop.xlane.xlu1 %1261 }
 0xa4d   :  { %2573 = vrcp.f32 %v1262_v14 }
 0xa53   :  { %v2574_v58 = vpop.eup %2573 }
 0xa54   :  { %v1264_v3 = vmul.f32 %v2574_v58, %v1262_v14 }
 0xa56   :  { %v1265_v7 = vsub.f32 2.0, %v1264_v3 }
 0xa58   :  { %v1266_v50 = vmul.f32 %v2574_v58, %v1265_v7  ;;  %v1410_v7 = vpop.f32.mrf.mxu1 }
 0xa64   :  { %v1257_v53 = vpop.permute.xlu1 %1256 }
 0xa65   :  { %v1259_v9 = vmul.f32 %v2572_v57, %v1257_v53 }
 0xa67   :  { %v3305_v13 = vmul.f32 %v1266_v50, %v1259_v9 }
 0xa69   :  { %2384 = vmatmul.msk.f32.vlgmr.msra.gmra.mxu3 %vm117_vm1, %v3305_v13  ;;  %2387 = vmatmul.msk.f32.vlgmr.msra.gmra.mxu2 %vm117_vm1, %v3305_v13 }
 0xa6a   :  { %1631 = vmatpush.msra.mxu2 %v2945_v27  ;;  %1571 = vmatpush.msra.mxu3 %v3236_v23 }
 0xa6c   :  { %1632 = vmatpush.msra.mxu2 %v2961_v35  ;;  %1572 = vmatpush.msra.mxu3 %v3240_v32 }
 0xa71   :  { %2390 = vmatmul.msk.f32.vlgmr.msrb.gmra.mxu3 %vm117_vm1, %v3305_v13  ;;  %2392 = vmatmul.msk.f32.vlgmr.msrb.gmra.mxu2 %vm117_vm1, %v3305_v13 }
 0xa72   :  { %1691 = vmatpush.msrb.mxu3 %v3000_v48  ;;  %1733 = vmatpush.msrb.mxu2 %v2970_v39 }
 0xa74   :  { %1692 = vmatpush.msrb.mxu3 %v3026_v61  ;;  %1734 = vmatpush.msrb.mxu2 %v2976_v42 }
 0xaec   :  { %v1310_v16 = vpop.f32.mrf.mxu3  ;;  %v1370_v5 = vpop.f32.mrf.mxu2 }
 0xaed   :  { %v1311_v10 = vadd.f32 %v1310_v16, %v1287_v15  ;;  %v1371_v11 = vadd.f32 %v1370_v5, %v1350_v6 }
 0xaef   :  { %v1313_v18 = vadd.f32 %v3326_v49, %v1311_v10  ;;  %v1373_v25 = vadd.f32 %v1371_v11, %v3051_v17 }
 0xaf1   :  { %v2385_v22 = vmul.f32 -1.442695, %v1313_v18  ;;  %v2388_v46 = vmul.f32 -1.442695, %v1373_v25 }
 0xaf3   :  { %2575 = vpow2.f32 %v2385_v22 }
 0xaf4   :  { %2577 = vpow2.f32 %v2388_v46  ;;  %v1472_v34 = vpop.f32.mrf.mxu2  ;;  %v1430_v3 = vpop.f32.mrf.mxu3 }
 0xaf5   :  { %v1473_v51 = vadd.f32 %v1472_v34, %v1452_v0  ;;  %v1431_v53 = vadd.f32 %v1430_v3, %v1410_v7 }
 0xaf7   :  { %v1475_v52 = vadd.f32 %v1473_v51, %v3053_v20  ;;  %v1433_v6 = vadd.f32 %v1431_v53, %v3057_v54 }
 0xaf9   :  { %v2576_v55 = vpop.eup %2575  ;;  %v2393_v57 = vmul.f32 -1.442695, %v1475_v52 }
 0xafa   :  { %v2578_v59 = vpop.eup %2577  ;;  %v1317_v14 = vadd.f32 1.0, %v2576_v55 }
 0xafb   :  { %v1377_v58 = vadd.f32 1.0, %v2578_v59  ;;  %2579 = vpow2.f32 %v2393_v57 }
 0xafc   :  { %2581 = vrcp.f32 %v1317_v14  ;;  %v1329_v25 = vand.u32 2147483648, %v1317_v14  ;;  %v1327_v0 = vand.u32 2147483647, %v1317_v14  ;;  %vm1323_vm10 = vweird.f32 %v1317_v14 }
 0xafd   :  { %2583 = vrcp.f32 %v1377_v58  ;;  %v1389_v22 = vand.u32 2147483648, %v1377_v58  ;;  %v1387_v51 = vand.u32 2147483647, %v1377_v58  ;;  %vm1383_vm11 = vweird.f32 %v1377_v58 }
 0xafe   :  { %v1330_v57 = vor.u32 1.1754944e-38, %v1329_v25  ;;  %vm1328_vm14 = vcmp.eq.f32.partialorder %v1327_v0, 8.507059e+37 }
 0xaff   :  { %v1390_v3 = vor.u32 1.1754944e-38, %v1389_v22  ;;  %vm1388_vm15 = vcmp.eq.f32.partialorder %v1387_v51, 8.507059e+37 }
 0xb01   :  { %v2580_v50 = vpop.eup %2579 }
 0xb02   :  { %v2582_v9 = vpop.eup %2581  ;;  %v1479_v15 = vadd.f32 1.0, %v2580_v50 }
 0xb03   :  { %v2584_v16 = vpop.eup %2583  ;;  %v1319_v5 = vmul.f32 %v2582_v9, %v1317_v14  ;;  %vm1324_vm8 = vweird.f32 %v2582_v9 }
 0xb04   :  { %v1379_v10 = vmul.f32 %v2584_v16, %v1377_v58  ;;  %2585 = vrcp.f32 %v1479_v15  ;;  %vm1384_vm9 = vweird.f32 %v2584_v16  ;;  %vm1325_vm12 = vmor %vm1323_vm10, %vm1324_vm8  ;;  %v1491_v25 = vand.u32 2147483648, %v1479_v15 }
 0xb05   :  { %v1320_v11 = vsub.f32 1.0, %v1319_v5  ;;  %2587 = vtanh.f32 %v1433_v6  ;;  %vm1385_vm13 = vmor %vm1383_vm11, %vm1384_vm9  ;;  %vm1485_vm3 = vweird.f32 %v1479_v15 }
 0xb06   :  { %v1380_v18 = vsub.f32 1.0, %v1379_v10  ;;  %v1492_v0 = vor.u32 1.1754944e-38, %v1491_v25 }
 0xb07   :  { %v1321_v46 = vmul.f32 %v2582_v9, %v1320_v11 }
 0xb08   :  { %v1381_v34 = vmul.f32 %v2584_v16, %v1380_v18 }
 0xb09   :  { %v1322_v52 = vadd.f32 %v2582_v9, %v1321_v46 }
 0xb0a   :  { %v2586_v55 = vpop.eup %2585  ;;  %v1382_v59 = vadd.f32 %v2584_v16, %v1381_v34 }
 0xb0b   :  { %v1326_v7 = vsel %vm1325_vm12, %v2582_v9, %v1322_v52  ;;  %v1481_v53 = vmul.f32 %v2586_v55, %v1479_v15  ;;  %v2588_v50 = vpop.eup %2587  ;;  %vm1486_vm2 = vweird.f32 %v2586_v55  ;;  %v1489_v9 = vand.u32 2147483647, %v1479_v15 }
 0xb0c   :  { %v1331_v6 = vsel %vm1328_vm14, %v1330_v57, %v1326_v7  ;;  %v1386_v5 = vsel %vm1385_vm13, %v2584_v16, %v1382_v59  ;;  %vm1487_vm4 = vmor %vm1485_vm3, %vm1486_vm2 }
 0xb0d   :  { %v1391_v10 = vsel %vm1388_vm15, %v1390_v3, %v1386_v5  ;;  %v1496_v11 = vmul.f32 %v2588_v50, %v1331_v6  ;;  %v1482_v18 = vsub.f32 1.0, %v1481_v53  ;;  %vm1490_vm5 = vcmp.eq.f32.partialorder %v1489_v9, 8.507059e+37 }
 0xb0e   :  { %v1495_v46 = vmul.f32 %v1391_v10, %v3256_v12 }
 0xb0f   :  { %v1483_v14 = vmul.f32 %v2586_v55, %v1482_v18 }
 0xb10   :  { %v3333_v26 = vadd.f32 %v1496_v11, %v1495_v46 }
 0xb11   :  { %v1484_v58 = vadd.f32 %v2586_v55, %v1483_v14 }
 0xb12   :  { %2589 = vtanh.f32 %v3333_v26  ;;  %v1507_v52 = vmul.f32 %v3197_v37, %v3333_v26 }
 0xb13   :  { %v1488_v22 = vsel %vm1487_vm4, %v2586_v55, %v1484_v58 }
 0xb14   :  { %v1493_v34 = vsel %vm1490_vm5, %v1492_v0, %v1488_v22 }
 0xb18   :  { %v2590_v16 = vpop.eup %2589 }
 0xb19   :  { %v1499_v51 = vmul.f32 %v2590_v16, %v1493_v34 }
 0xb1b   :  { %2394 = vmatmul.msk.f32.vlgmr.msra.gmra.mxu1 %vm112_vm0, %v1499_v51  ;;  %1505 = vst.msk [vmem:[#allocation11 + $0x8] sm:$0xff] %vm112_vm0, %v1499_v51  ;;  %2397 = vmatmul.msk.f32.vlgmr.msra.gmra.mxu0 %vm112_vm0, %v1499_v51  ;;  %v1506_v12 = vmul.f32 %v3190_v21, %v1499_v51 }
 0xb1c   :  { %1876 = vmatpush.msra.mxu0 %v2949_v29  ;;  %1813 = vmatpush.msra.mxu1 %v3270_v19 }
 0xb1d   :  { %v1508_v15 = vadd.f32 %v1507_v52, %v1506_v12 }
 0xb1e   :  { %1877 = vmatpush.msra.mxu0 %v2947_v28  ;;  %1814 = vmatpush.msra.mxu1 %v3274_v43 }
 0xb1f   :  { %v1509_v55 = vsel %vm112_vm0, %v1508_v15, 0.0 }
 0xb20   :  { %1878 = vmatpush.msra.mxu0 %v2954_v31  ;;  %1815 = vmatpush.msra.mxu1 %v3279_v40 }
 0xb21   :  { %1510 = vadd.xlane.f32.xlu2 %v1509_v55 }
 0xb22   :  { %1879 = vmatpush.msra.mxu0 %v2963_v36  ;;  %1816 = vmatpush.msra.mxu1 %v3283_v1 }
 0xb23   :  { %2400 = vmatmul.msk.f32.vlgmr.msrb.gmra.mxu1 %vm112_vm0, %v1499_v51  ;;  %2402 = vmatmul.msk.f32.vlgmr.msrb.gmra.mxu0 %vm112_vm0, %v1499_v51 }
 0xb24   :  { %1936 = vmatpush.msrb.mxu1 %v2998_v47  ;;  %1978 = vmatpush.msrb.mxu0 %v2968_v38 }
 0xb26   :  { %1937 = vmatpush.msrb.mxu1 %v3024_v60  ;;  %1979 = vmatpush.msrb.mxu0 %v2974_v41 }
 0xb28   :  { %1938 = vmatpush.msrb.mxu1 %v3028_v62  ;;  %1980 = vmatpush.msrb.mxu0 %v2984_v45 }
 0xb2a   :  { %1939 = vmatpush.msrb.mxu1 %v3030_v63  ;;  %1981 = vmatpush.msrb.mxu0 %v2982_v44 }
 0xb94   :  { %v1511_v57 = vpop.xlane.xlu2 %1510 }
 0xb95   :  { %v1512_v59 = vadd.f32 %v3224_v8, %v1511_v57 }
 0xb97   :  { %v1513_v3 = vsel %vm117_vm1, %v1512_v59, -inf }
 0xb98   :  { %1514 = vmax.xlane.f32.xlu2 %v1513_v3  ;;  %v1551_v22 = vpop.f32.mrf.mxu1 }
 0xbb0   :  { %1519 = vrot.lane.b32.xlu2 %v3301_v56, %s2831_s4 }
 0xbb8   :  { %1787 = vrot.lane.b32.xlu2 %v3301_v56, %s2826_s28 }
 0xc0b   :  { %v1515_v7 = vpop.xlane.xlu2 %1514 }
 0xc0c   :  { %v1516_v53 = vsub.f32 %v1512_v59, %v1515_v7 }
 0xc0e   :  { %v1517_v50 = vmul.f32 1.442695, %v1516_v53 }
 0xc10   :  { %2591 = vpow2.f32 %v1517_v50 }
 0xc13   :  { %v1520_v46 = vpop.permute.xlu2 %1519 }
 0xc16   :  { %v2592_v6 = vpop.eup %2591 }
 0xc17   :  { %v1523_v5 = vsel %vm117_vm1, %v2592_v6, 0.0  ;;  %v1522_v58 = vmul.f32 %v2592_v6, %v1520_v46 }
 0xc18   :  { %1524 = vadd.xlane.f32.xlu1 %v1523_v5 }
 0xc31   :  { %2054 = vrot.lane.b32.xlu1 %v3301_v56, %s2832_s1 }
 0xc39   :  { %702 = vrot.lane.b32.xlu1 %v3119_v33, %s2826_s28 }
 0xc41   :  { %970 = vrot.lane.b32.xlu1 %v3181_v2, %s2828_s29 }
 0xc49   :  { %1500 = vrot.lane.b32.xlu1 %v3305_v13, %s2828_s29  ;;  %v1614_v13 = vpop.f32.mrf.mxu0 }
 0xc51   :  { %v1716_v57 = vpop.f32.mrf.mxu0 }
 0xc8b   :  { %v1525_v10 = vpop.xlane.xlu1 %1524 }
 0xc8c   :  { %2593 = vrcp.f32 %v1525_v10 }
 0xc92   :  { %v2594_v11 = vpop.eup %2593 }
 0xc93   :  { %v1527_v18 = vmul.f32 %v2594_v11, %v1525_v10 }
 0xc95   :  { %v1528_v14 = vsub.f32 2.0, %v1527_v18  ;;  %v1674_v18 = vpop.f32.mrf.mxu1 }
 0xc97   :  { %v1529_v25 = vmul.f32 %v2594_v11, %v1528_v14 }
 0xc99   :  { %v3376_v9 = vmul.f32 %v1529_v25, %v1522_v58 }
 0xc9b   :  { %2395 = vmatmul.msk.f32.vlgmr.msra.gmra.mxu3 %vm117_vm1, %v3376_v9  ;;  %2398 = vmatmul.msk.f32.vlgmr.msra.gmra.mxu2 %vm117_vm1, %v3376_v9 }
 0xc9c   :  { %1898 = vmatpush.msra.mxu2 %v2945_v27  ;;  %1838 = vmatpush.msra.mxu3 %v3236_v23 }
 0xc9e   :  { %1899 = vmatpush.msra.mxu2 %v2961_v35  ;;  %1839 = vmatpush.msra.mxu3 %v3240_v32 }
 0xca3   :  { %v3386_v33 = vpop.permute.xlu1 %2054  ;;  %2401 = vmatmul.msk.f32.vlgmr.msrb.gmra.mxu3 %vm117_vm1, %v3376_v9  ;;  %2403 = vmatmul.msk.f32.vlgmr.msrb.gmra.mxu2 %vm117_vm1, %v3376_v9 }
 0xca4   :  { %1958 = vmatpush.msrb.mxu3 %v3000_v48  ;;  %2000 = vmatpush.msrb.mxu2 %v2970_v39 }
 0xca6   :  { %1959 = vmatpush.msrb.mxu3 %v3026_v61  ;;  %2001 = vmatpush.msrb.mxu2 %v2976_v42 }
 0xcab   :  { %v703_v2 = vpop.permute.xlu1 %702 }
 0xcac   :  { %706 = vst.msk [vmem:[#allocation11] sm:$0xff] %vm705_vm6, %v703_v2 }
 0xcb3   :  { %v971_v56 = vpop.permute.xlu1 %970 }
 0xcb4   :  { %974 = vst.msk [vmem:[#allocation11] sm:$0xff] %vm973_vm7, %v971_v56 }
 0xd1e   :  { %v1574_v0 = vpop.f32.mrf.mxu3  ;;  %v1634_v16 = vpop.f32.mrf.mxu2 }
 0xd1f   :  { %v1575_v34 = vadd.f32 %v1574_v0, %v1551_v22  ;;  %v1635_v51 = vadd.f32 %v1634_v16, %v1614_v13 }
 0xd21   :  { %v1577_v12 = vadd.f32 %v3326_v49, %v1575_v34  ;;  %v1637_v52 = vadd.f32 %v1635_v51, %v3051_v17 }
 0xd23   :  { %v2396_v15 = vmul.f32 -1.442695, %v1577_v12  ;;  %v2399_v55 = vmul.f32 -1.442695, %v1637_v52 }
 0xd25   :  { %2595 = vpow2.f32 %v2396_v15 }
 0xd26   :  { %2597 = vpow2.f32 %v2399_v55  ;;  %v1736_v59 = vpop.f32.mrf.mxu2  ;;  %v1694_v11 = vpop.f32.mrf.mxu3 }
 0xd27   :  { %v1737_v3 = vadd.f32 %v1736_v59, %v1716_v57  ;;  %v1695_v46 = vadd.f32 %v1694_v11, %v1674_v18 }
 0xd29   :  { %v1739_v7 = vadd.f32 %v1737_v3, %v3053_v20  ;;  %v1697_v25 = vadd.f32 %v1695_v46, %v3057_v54 }
 0xd2b   :  { %v2596_v53 = vpop.eup %2595  ;;  %v2404_v50 = vmul.f32 -1.442695, %v1739_v7 }
 0xd2c   :  { %v2598_v6 = vpop.eup %2597  ;;  %v1581_v5 = vadd.f32 1.0, %v2596_v53 }
 0xd2d   :  { %v1641_v10 = vadd.f32 1.0, %v2598_v6  ;;  %2599 = vpow2.f32 %v2404_v50 }
 0xd2e   :  { %2601 = vrcp.f32 %v1581_v5  ;;  %v1593_v34 = vand.u32 2147483648, %v1581_v5  ;;  %v1591_v52 = vand.u32 2147483647, %v1581_v5  ;;  %vm1587_vm10 = vweird.f32 %v1581_v5 }
 0xd2f   :  { %2603 = vrcp.f32 %v1641_v10  ;;  %v1653_v51 = vand.u32 2147483648, %v1641_v10  ;;  %v1651_v55 = vand.u32 2147483647, %v1641_v10  ;;  %vm1647_vm11 = vweird.f32 %v1641_v10 }
 0xd30   :  { %v1594_v3 = vor.u32 1.1754944e-38, %v1593_v34  ;;  %vm1592_vm14 = vcmp.eq.f32.partialorder %v1591_v52, 8.507059e+37 }
 0xd31   :  { %v1654_v53 = vor.u32 1.1754944e-38, %v1653_v51  ;;  %vm1652_vm15 = vcmp.eq.f32.partialorder %v1651_v55, 8.507059e+37 }
 0xd33   :  { %v2600_v14 = vpop.eup %2599 }
 0xd34   :  { %v2602_v58 = vpop.eup %2601  ;;  %v1743_v2 = vadd.f32 1.0, %v2600_v14 }
 0xd35   :  { %v2604_v56 = vpop.eup %2603  ;;  %v1583_v13 = vmul.f32 %v2602_v58, %v1581_v5  ;;  %vm1588_vm8 = vweird.f32 %v2602_v58 }
 0xd36   :  { %v1643_v22 = vmul.f32 %v2604_v56, %v1641_v10  ;;  %2605 = vrcp.f32 %v1743_v2  ;;  %vm1648_vm9 = vweird.f32 %v2604_v56  ;;  %vm1589_vm12 = vmor %vm1587_vm10, %vm1588_vm8  ;;  %vm1749_vm3 = vweird.f32 %v1743_v2 }
 0xd37   :  { %v1584_v0 = vsub.f32 1.0, %v1583_v13  ;;  %2607 = vtanh.f32 %v1697_v25  ;;  %vm1649_vm13 = vmor %vm1647_vm11, %vm1648_vm9 }
 0xd38   :  { %v1644_v16 = vsub.f32 1.0, %v1643_v22 }
 0xd39   :  { %v1585_v12 = vmul.f32 %v2602_v58, %v1584_v0 }
 0xd3a   :  { %v1645_v15 = vmul.f32 %v2604_v56, %v1644_v16  ;;  %v1755_v16 = vand.u32 2147483648, %v1743_v2 }
 0xd3b   :  { %v1586_v57 = vadd.f32 %v2602_v58, %v1585_v12 }
 0xd3c   :  { %v2606_v59 = vpop.eup %2605  ;;  %v1646_v7 = vadd.f32 %v2604_v56, %v1645_v15  ;;  %v1756_v51 = vor.u32 1.1754944e-38, %v1755_v16 }
 0xd3d   :  { %v1590_v50 = vsel %vm1589_vm12, %v2602_v58, %v1586_v57  ;;  %v1745_v6 = vmul.f32 %v2606_v59, %v1743_v2  ;;  %v2608_v11 = vpop.eup %2607  ;;  %vm1750_vm2 = vweird.f32 %v2606_v59  ;;  %v1753_v58 = vand.u32 2147483647, %v1743_v2 }
 0xd3e   :  { %v1595_v18 = vsel %vm1592_vm14, %v1594_v3, %v1590_v50  ;;  %v1650_v46 = vsel %vm1649_vm13, %v2604_v56, %v1646_v7  ;;  %vm1751_vm4 = vmor %vm1749_vm3, %vm1750_vm2 }
 0xd3f   :  { %v1655_v14 = vsel %vm1652_vm15, %v1654_v53, %v1650_v46  ;;  %v1760_v25 = vmul.f32 %v2608_v11, %v1595_v18  ;;  %v1746_v13 = vsub.f32 1.0, %v1745_v6  ;;  %vm1754_vm5 = vcmp.eq.f32.partialorder %v1753_v58, 8.507059e+37 }
 0xd40   :  { %v1759_v22 = vmul.f32 %v1655_v14, %v3333_v26 }
 0xd41   :  { %v1747_v5 = vmul.f32 %v2606_v59, %v1746_v13 }
 0xd42   :  { %v3403_v0 = vadd.f32 %v1760_v25, %v1759_v22 }
 0xd43   :  { %v1748_v10 = vadd.f32 %v2606_v59, %v1747_v5 }
 0xd44   :  { %2609 = vtanh.f32 %v3403_v0  ;;  %v1775_v15 = vmul.f32 %v3197_v37, %v3403_v0  ;;  %v1788_v37 = vpop.permute.xlu2 %1787 }
 0xd45   :  { %v1752_v34 = vsel %vm1751_vm4, %v2606_v59, %v1748_v10 }
 0xd46   :  { %v1757_v12 = vsel %vm1754_vm5, %v1756_v51, %v1752_v34  ;;  %vm1241_vm5 = vcmask 1048320  }
 0xd4a   :  { %v2610_v56 = vpop.eup %2609 }
 0xd4b   :  { %v1763_v52 = vmul.f32 %v2610_v56, %v1757_v12 }
 0xd4d   :  { %1770 = vrot.lane.b32.xlu1 %v1763_v52, %s2826_s28  ;;  %2405 = vmatmul.msk.f32.vlgmr.msra.gmra.mxu1 %vm112_vm0, %v1763_v52  ;;  %v1774_v26 = vmul.f32 %v3190_v21, %v1763_v52 }
 0xd4e   :  { %2408 = vmatmul.msk.f32.vlgmr.msra.gmra.mxu0 %vm112_vm0, %v1763_v52  ;;  %2080 = vmatpush.msra.mxu1 %v3270_v19 }
 0xd4f   :  { %2143 = vmatpush.msra.mxu0 %v2949_v29  ;;  %v1776_v2 = vadd.f32 %v1775_v15, %v1774_v26 }
 0xd50   :  { %2081 = vmatpush.msra.mxu1 %v3274_v43 }
 0xd51   :  { %2144 = vmatpush.msra.mxu0 %v2947_v28  ;;  %v1777_v55 = vsel %vm112_vm0, %v1776_v2, 0.0  ;;  %v3431_v28 = vpop.permute.xlu1 %1500 }
 0xd52   :  { %2082 = vmatpush.msra.mxu1 %v3279_v40  ;;  %1778 = vadd.xlane.f32.xlu0 %v1777_v55 }
 0xd53   :  { %2145 = vmatpush.msra.mxu0 %v2954_v31 }
 0xd54   :  { %2083 = vmatpush.msra.mxu1 %v3283_v1 }
 0xd55   :  { %2146 = vmatpush.msra.mxu0 %v2963_v36  ;;  %2411 = vmatmul.msk.f32.vlgmr.msrb.gmra.mxu1 %vm112_vm0, %v1763_v52 }
 0xd56   :  { %2413 = vmatmul.msk.f32.vlgmr.msrb.gmra.mxu0 %vm112_vm0, %v1763_v52  ;;  %2203 = vmatpush.msrb.mxu1 %v2998_v47 }
 0xd57   :  { %2245 = vmatpush.msrb.mxu0 %v2968_v38 }
 0xd58   :  { %2204 = vmatpush.msrb.mxu1 %v3024_v60 }
 0xd59   :  { %2246 = vmatpush.msrb.mxu0 %v2974_v41 }
 0xd5a   :  { %2205 = vmatpush.msrb.mxu1 %v3028_v62 }
 0xd5b   :  { %2247 = vmatpush.msrb.mxu0 %v2984_v45 }
 0xd5c   :  { %2206 = vmatpush.msrb.mxu1 %v3030_v63 }
 0xd5d   :  { %2248 = vmatpush.msrb.mxu0 %v2982_v44 }
 0xdbf   :  { %v1771_v29 = vpop.permute.xlu1 %1770 }
 0xdc0   :  { %1773 = vst.msk [vmem:[#allocation11 + $0x8] sm:$0xff] %vm705_vm6, %v1771_v29 }
 0xdc5   :  { %v1779_v31 = vpop.xlane.xlu0 %1778 }
 0xdc6   :  { %v1780_v36 = vadd.f32 %v3224_v8, %v1779_v31 }
 0xdc8   :  { %v1781_v38 = vsel %vm117_vm1, %v1780_v36, -inf }
 0xdc9   :  { %1782 = vmax.xlane.f32.xlu0 %v1781_v38 }
 0xe3c   :  { %v1783_v41 = vpop.xlane.xlu0 %1782 }
 0xe3d   :  { %v1784_v47 = vsub.f32 %v1780_v36, %v1783_v41 }
 0xe3f   :  { %v1785_v60 = vmul.f32 1.442695, %v1784_v47 }
 0xe41   :  { %2611 = vpow2.f32 %v1785_v60 }
 0xe47   :  { %v2612_v45 = vpop.eup %2611 }
 0xe48   :  { %v1791_v62 = vsel %vm117_vm1, %v2612_v45, 0.0  ;;  %v1790_v43 = vmul.f32 %v2612_v45, %v1788_v37 }
 0xe49   :  { %1792 = vadd.xlane.f32.xlu0 %v1791_v62 }
 0xebc   :  { %v1793_v44 = vpop.xlane.xlu0 %1792 }
 0xebd   :  { %2613 = vrcp.f32 %v1793_v44 }
 0xec3   :  { %v2614_v63 = vpop.eup %2613 }
 0xec4   :  { %v1795_v21 = vmul.f32 %v2614_v63, %v1793_v44 }
 0xec6   :  { %v1796_v19 = vsub.f32 2.0, %v1795_v21 }
 0xec8   :  { %v1797_v40 = vmul.f32 %v2614_v63, %v1796_v19 }
 0xeca   :  { %v3437_v8 = vmul.f32 %v1797_v40, %v1790_v43 }
 0xecc   :  { %2406 = vmatmul.msk.f32.vlgmr.msra.gmra.mxu3 %vm117_vm1, %v3437_v8  ;;  %2409 = vmatmul.msk.f32.vlgmr.msra.gmra.mxu2 %vm117_vm1, %v3437_v8 }
 0xecd   :  { %2165 = vmatpush.msra.mxu2 %v2945_v27  ;;  %2105 = vmatpush.msra.mxu3 %v3236_v23  ;;  %v1881_v27 = vpop.f32.mrf.mxu0  ;;  %v1818_v23 = vpop.f32.mrf.mxu1 }
 0xecf   :  { %2166 = vmatpush.msra.mxu2 %v2961_v35  ;;  %2106 = vmatpush.msra.mxu3 %v3240_v32 }
 0xed4   :  { %2412 = vmatmul.msk.f32.vlgmr.msrb.gmra.mxu3 %vm117_vm1, %v3437_v8  ;;  %2414 = vmatmul.msk.f32.vlgmr.msrb.gmra.mxu2 %vm117_vm1, %v3437_v8 }
 0xed5   :  { %2225 = vmatpush.msrb.mxu3 %v3000_v48  ;;  %2267 = vmatpush.msrb.mxu2 %v2970_v39  ;;  %v1983_v48 = vpop.f32.mrf.mxu0  ;;  %v1941_v25 = vpop.f32.mrf.mxu1 }
 0xed7   :  { %2226 = vmatpush.msrb.mxu3 %v3026_v61  ;;  %2268 = vmatpush.msrb.mxu2 %v2976_v42 }
 0xf4f   :  { %v1841_v1 = vpop.f32.mrf.mxu3  ;;  %v1901_v35 = vpop.f32.mrf.mxu2 }
 0xf50   :  { %v1842_v57 = vadd.f32 %v1841_v1, %v1818_v23  ;;  %v1902_v32 = vadd.f32 %v1901_v35, %v1881_v27 }
 0xf52   :  { %v1844_v59 = vadd.f32 %v3326_v49, %v1842_v57  ;;  %v1904_v3 = vadd.f32 %v1902_v32, %v3051_v17 }
 0xf54   :  { %v2407_v7 = vmul.f32 -1.442695, %v1844_v59  ;;  %v2410_v53 = vmul.f32 -1.442695, %v1904_v3 }
 0xf56   :  { %2615 = vpow2.f32 %v2407_v7 }
 0xf57   :  { %2617 = vpow2.f32 %v2410_v53  ;;  %v2003_v39 = vpop.f32.mrf.mxu2  ;;  %v1961_v14 = vpop.f32.mrf.mxu3 }
 0xf58   :  { %v2004_v50 = vadd.f32 %v2003_v39, %v1983_v48  ;;  %v1962_v13 = vadd.f32 %v1961_v14, %v1941_v25  ;;  %v2663_v48 = vld [vmem:[%s3518_s6] ss:$0 sm:$0xff] }
 0xf5a   :  { %v2006_v61 = vadd.f32 %v2004_v50, %v3053_v20  ;;  %v1964_v10 = vadd.f32 %v1962_v13, %v3057_v54 }
 0xf5c   :  { %v2616_v42 = vpop.eup %2615  ;;  %v2415_v6 = vmul.f32 -1.442695, %v2006_v61 }
 0xf5d   :  { %v2618_v11 = vpop.eup %2617  ;;  %v1848_v18 = vadd.f32 1.0, %v2616_v42 }
 0xf5e   :  { %v1908_v46 = vadd.f32 1.0, %v2618_v11  ;;  %2619 = vpow2.f32 %v2415_v6  ;;  %v2664_v11 = vld [vmem:[#allocation5] sm:$0xff] }
 0xf5f   :  { %2621 = vrcp.f32 %v1848_v18  ;;  %v1860_v52 = vand.u32 2147483648, %v1848_v18  ;;  %v1858_v2 = vand.u32 2147483647, %v1848_v18  ;;  %vm1854_vm9 = vweird.f32 %v1848_v18 }
 0xf60   :  { %2623 = vrcp.f32 %v1908_v46  ;;  %v1920_v26 = vand.u32 2147483648, %v1908_v46  ;;  %v1918_v29 = vand.u32 2147483647, %v1908_v46  ;;  %vm1914_vm10 = vweird.f32 %v1908_v46 }
 0xf61   :  { %v1861_v38 = vor.u32 1.1754944e-38, %v1860_v52  ;;  %vm1859_vm13 = vcmp.eq.f32.partialorder %v1858_v2, 8.507059e+37 }
 0xf62   :  { %v1921_v47 = vor.u32 1.1754944e-38, %v1920_v26  ;;  %vm1919_vm14 = vcmp.eq.f32.partialorder %v1918_v29, 8.507059e+37 }
 0xf64   :  { %v2620_v22 = vpop.eup %2619 }
 0xf65   :  { %v2622_v5 = vpop.eup %2621  ;;  %v2010_v16 = vadd.f32 1.0, %v2620_v22 }
 0xf66   :  { %v2624_v58 = vpop.eup %2623  ;;  %v1850_v34 = vmul.f32 %v2622_v5, %v1848_v18  ;;  %vm1855_vm6 = vweird.f32 %v2622_v5 }
 0xf67   :  { %v1910_v51 = vmul.f32 %v2624_v58, %v1908_v46  ;;  %2625 = vrcp.f32 %v2010_v16  ;;  %vm1915_vm8 = vweird.f32 %v2624_v58  ;;  %vm1856_vm11 = vmor %vm1854_vm9, %vm1855_vm6  ;;  %v2022_v1 = vand.u32 2147483648, %v2010_v16 }
 0xf68   :  { %v1851_v56 = vsub.f32 1.0, %v1850_v34  ;;  %2627 = vtanh.f32 %v1964_v10  ;;  %vm1916_vm12 = vmor %vm1914_vm10, %vm1915_vm8  ;;  %vm2016_vm2 = vweird.f32 %v2010_v16  ;;  %v2020_v35 = vand.u32 2147483647, %v2010_v16 }
 0xf69   :  { %v1911_v12 = vsub.f32 1.0, %v1910_v51  ;;  %v2023_v32 = vor.u32 1.1754944e-38, %v2022_v1  ;;  %vm1235_vm6 = vcmask 523648   ;;  %vm1503_vm8 = vcmask 654848  }
 0xf6a   :  { %v1852_v15 = vmul.f32 %v2622_v5, %v1851_v56  ;;  %vm2021_vm4 = vcmp.eq.f32.partialorder %v2020_v35, 8.507059e+37  ;;  %vm1767_vm9 = vcmask 786048   ;;  %vm2034_vm10 = vcmask 917248  }
 0xf6b   :  { %v1912_v55 = vmul.f32 %v2624_v58, %v1911_v12 }
 0xf6c   :  { %v1853_v31 = vadd.f32 %v2622_v5, %v1852_v15 }
 0xf6d   :  { %v2626_v36 = vpop.eup %2625  ;;  %v1913_v41 = vadd.f32 %v2624_v58, %v1912_v55 }
 0xf6e   :  { %v1857_v60 = vsel %vm1856_vm11, %v2622_v5, %v1853_v31  ;;  %v2012_v45 = vmul.f32 %v2626_v36, %v2010_v16  ;;  %v2628_v62 = vpop.eup %2627  ;;  %vm2017_vm15 = vweird.f32 %v2626_v36  ;;  %vm2301_vm11 = vcmask 1048448  }
 0xf6f   :  { %v1862_v44 = vsel %vm1859_vm13, %v1861_v38, %v1857_v60  ;;  %v1917_v63 = vsel %vm1916_vm12, %v2624_v58, %v1913_v41  ;;  %vm2018_vm3 = vmor %vm2016_vm2, %vm2017_vm15 }
 0xf70   :  { %v1922_v21 = vsel %vm1919_vm14, %v1921_v47, %v1917_v63  ;;  %v2027_v37 = vmul.f32 %v2628_v62, %v1862_v44  ;;  %v2013_v19 = vsub.f32 1.0, %v2012_v45 }
 0xf71   :  { %v2026_v43 = vmul.f32 %v1922_v21, %v3403_v0  ;;  %v2662_v0 = vld [vmem:[%s3517_s5] ss:$0 sm:$0xff] }
 0xf72   :  { %v2014_v40 = vmul.f32 %v2626_v36, %v2013_v19 }
 0xf73   :  { %v3460_v27 = vadd.f32 %v2027_v37, %v2026_v43 }
 0xf74   :  { %v2015_v23 = vadd.f32 %v2626_v36, %v2014_v40 }
 0xf75   :  { %2629 = vtanh.f32 %v3460_v27  ;;  %v2042_v39 = vmul.f32 %v2663_v48, %v3460_v27 }
 0xf76   :  { %v2019_v57 = vsel %vm2018_vm3, %v2626_v36, %v2015_v23 }
 0xf77   :  { %v2024_v3 = vsel %vm2021_vm4, %v2023_v32, %v2019_v57 }
 0xf7b   :  { %v2630_v59 = vpop.eup %2629 }
 0xf7c   :  { %v2030_v7 = vmul.f32 %v2630_v59, %v2024_v3 }
 0xf7e   :  { %2037 = vrot.lane.b32.xlu1 %v2030_v7, %s2828_s29  ;;  %2416 = vmatmul.msk.f32.vlgmr.msra.gmra.mxu1 %vm112_vm0, %v2030_v7  ;;  %v2041_v53 = vmul.f32 %v2662_v0, %v2030_v7 }
 0xf7f   :  { %2419 = vmatmul.msk.f32.vlgmr.msra.gmra.mxu0 %vm112_vm0, %v2030_v7 }
 0xf80   :  { %v2043_v50 = vadd.f32 %v2042_v39, %v2041_v53 }
 0xf82   :  { %v2044_v61 = vsel %vm112_vm0, %v2043_v50, 0.0 }
 0xf83   :  { %2045 = vadd.xlane.f32.xlu0 %v2044_v61 }
 0xf86   :  { %2422 = vmatmul.msk.f32.vlgmr.msrb.gmra.mxu1 %vm112_vm0, %v2030_v7 }
 0xf87   :  { %2424 = vmatmul.msk.f32.vlgmr.msrb.gmra.mxu0 %vm112_vm0, %v2030_v7  ;;  %vm699_vm0 = vcmask 261248  }
 0xff0   :  { %v2038_v42 = vpop.permute.xlu1 %2037 }
 0xff1   :  { %2040 = vst.msk [vmem:[#allocation11 + $0x8] sm:$0xff] %vm973_vm7, %v2038_v42  ;;  %vm967_vm7 = vcmask 392448  }
 0xff6   :  { %v2046_v6 = vpop.xlane.xlu0 %2045 }
 0xff7   :  { %v2047_v18 = vadd.f32 %v2664_v11, %v2046_v6 }
 0xff9   :  { %v2048_v46 = vsel %vm117_vm1, %v2047_v18, -inf }
 0xffa   :  { %2049 = vmax.xlane.f32.xlu2 %v2048_v46 }
 0xffb   :  { %v2085_v2 = vpop.f32.mrf.mxu1 }
 0xffc   :  { %v2148_v15 = vpop.f32.mrf.mxu0 }
0x1003   :  { %v2208_v43 = vpop.f32.mrf.mxu1 }
0x1004   :  { %v2250_v60 = vpop.f32.mrf.mxu0 }
0x1012   :  { %1238 = vrot.lane.b32.xlu2 %v3259_v24, %s2825_s27  ;;  %v3523_v24 = vld [vmem:[#allocation18_spill] sm:$0xff] }
0x106d   :  { %v2050_v14 = vpop.xlane.xlu2 %2049 }
0x106e   :  { %v2051_v25 = vsub.f32 %v2047_v18, %v2050_v14 }
0x1070   :  { %v2052_v13 = vmul.f32 1.442695, %v2051_v25 }
0x1072   :  { %2631 = vpow2.f32 %v2052_v13 }
0x1075   :  { %v1239_v22 = vpop.permute.xlu2 %1238 }
0x1076   :  { %1242 = vst.msk [vmem:[#allocation11] sm:$0xff] %vm1241_vm5, %v1239_v22 }
0x1078   :  { %v2632_v5 = vpop.eup %2631 }
0x1079   :  { %v2058_v10 = vsel %vm117_vm1, %v2632_v5, 0.0  ;;  %v2057_v56 = vmul.f32 %v2632_v5, %v3386_v33 }
0x107a   :  { %2059 = vadd.xlane.f32.xlu0 %v2058_v10 }
0x108e   :  { %696 = vrot.lane.b32.xlu0 %v3093_v30, %s2832_s1 }
0x1096   :  { %964 = vrot.lane.b32.xlu0 %v3155_v4, %s2826_s28 }
0x109e   :  { %1232 = vrot.lane.b32.xlu0 %v3523_v24, %s2831_s4 }
0x10a6   :  { %1764 = vrot.lane.b32.xlu0 %v3376_v9, %s2830_s15 }
0x10ae   :  { %2031 = vrot.lane.b32.xlu0 %v3437_v8, %s2825_s27 }
0x10ed   :  { %v2060_v16 = vpop.xlane.xlu0 %2059 }
0x10ee   :  { %2633 = vrcp.f32 %v2060_v16 }
0x10f4   :  { %v2634_v58 = vpop.eup %2633 }
0x10f5   :  { %v2062_v34 = vmul.f32 %v2634_v58, %v2060_v16 }
0x10f7   :  { %v2063_v51 = vsub.f32 2.0, %v2062_v34 }
0x10f9   :  { %v2064_v30 = vmul.f32 %v2634_v58, %v2063_v51 }
0x10fb   :  { %v2065_v12 = vmul.f32 %v2064_v30, %v2057_v56 }
0x10fd   :  { %2298 = vrot.lane.b32.xlu0 %v2065_v12, %s2829_s10  ;;  %2417 = vmatmul.msk.f32.vlgmr.msra.gmra.mxu3 %vm117_vm1, %v2065_v12 }
0x10fe   :  { %2420 = vmatmul.msk.f32.vlgmr.msra.gmra.mxu2 %vm117_vm1, %v2065_v12 }
0x1100   :  { %v697_v4 = vpop.permute.xlu0 %696 }
0x1101   :  { %700 = vst.msk [vmem:[#allocation10] sm:$0xff] %vm699_vm0, %v697_v4 }
0x1105   :  { %2423 = vmatmul.msk.f32.vlgmr.msrb.gmra.mxu3 %vm117_vm1, %v2065_v12 }
0x1106   :  { %2425 = vmatmul.msk.f32.vlgmr.msrb.gmra.mxu2 %vm117_vm1, %v2065_v12 }
0x1108   :  { %v965_v9 = vpop.permute.xlu0 %964 }
0x1109   :  { %968 = vst.msk [vmem:[#allocation10] sm:$0xff] %vm967_vm7, %v965_v9 }
0x1110   :  { %v1233_v33 = vpop.permute.xlu0 %1232 }
0x1111   :  { %1236 = vst.msk [vmem:[#allocation10] sm:$0xff] %vm1235_vm6, %v1233_v33 }
0x1112   :  { %1504 = vst.msk [vmem:[#allocation10] sm:$0xff] %vm1503_vm8, %v3431_v28 }
0x1118   :  { %v1765_v8 = vpop.permute.xlu0 %1764 }
0x1119   :  { %1768 = vst.msk [vmem:[#allocation10] sm:$0xff] %vm1767_vm9, %v1765_v8 }
0x1120   :  { %v2032_v52 = vpop.permute.xlu0 %2031 }
0x1121   :  { %2035 = vst.msk [vmem:[#allocation10] sm:$0xff] %vm2034_vm10, %v2032_v52 }
0x116f   :  { %v2299_v26 = vpop.permute.xlu0 %2298 }
0x1170   :  { %2302 = vst.msk [vmem:[#allocation10] sm:$0xff] %vm2301_vm11, %v2299_v26 }
0x1171   :  { %2318 = dma.vmem_to_hbm [thread:$0]  %s2314_s23, 128, %s2316_s22, [#allocation4]  }
0x1180   :  { %v2108_v55 = vpop.f32.mrf.mxu3 }
0x1181   :  { %v2109_v29 = vadd.f32 %v2108_v55, %v2085_v2  ;;  %v2168_v31 = vpop.f32.mrf.mxu2 }
0x1182   :  { %v2169_v36 = vadd.f32 %v2168_v31, %v2148_v15 }
0x1183   :  { %v2111_v38 = vadd.f32 %v3326_v49, %v2109_v29 }
0x1184   :  { %v2171_v41 = vadd.f32 %v2169_v36, %v3051_v17 }
0x1185   :  { %v2418_v28 = vmul.f32 -1.442695, %v2111_v38 }
0x1186   :  { %v2421_v47 = vmul.f32 -1.442695, %v2171_v41 }
0x1187   :  { %2635 = vpow2.f32 %v2418_v28 }
0x1188   :  { %2637 = vpow2.f32 %v2421_v47  ;;  %v2228_v19 = vpop.f32.mrf.mxu3 }
0x1189   :  { %v2270_v45 = vpop.f32.mrf.mxu2  ;;  %v2229_v40 = vadd.f32 %v2228_v19, %v2208_v43 }
0x118a   :  { %v2271_v62 = vadd.f32 %v2270_v45, %v2250_v60 }
0x118b   :  { %v2231_v1 = vadd.f32 %v2229_v40, %v3057_v54 }
0x118c   :  { %v2273_v44 = vadd.f32 %v2271_v62, %v3053_v20 }
0x118d   :  { %v2636_v49 = vpop.eup %2635 }
0x118e   :  { %v2638_v17 = vpop.eup %2637  ;;  %v2115_v63 = vadd.f32 1.0, %v2636_v49  ;;  %v2426_v21 = vmul.f32 -1.442695, %v2273_v44 }
0x118f   :  { %v2175_v37 = vadd.f32 1.0, %v2638_v17 }
0x1190   :  { %2639 = vrcp.f32 %v2115_v63  ;;  %v2125_v0 = vand.u32 2147483647, %v2115_v63  ;;  %v2127_v53 = vand.u32 2147483648, %v2115_v63  ;;  %vm2121_vm13 = vweird.f32 %v2115_v63 }
0x1191   :  { %2641 = vrcp.f32 %v2175_v37  ;;  %v2187_v48 = vand.u32 2147483648, %v2175_v37  ;;  %v2185_v61 = vand.u32 2147483647, %v2175_v37  ;;  %vm2181_vm14 = vweird.f32 %v2175_v37 }
0x1192   :  { %2643 = vpow2.f32 %v2426_v21  ;;  %v2128_v54 = vor.u32 1.1754944e-38, %v2127_v53  ;;  %vm2126_vm3 = vcmp.eq.f32.partialorder %v2125_v0, 8.507059e+37 }
0x1193   :  { %2645 = vtanh.f32 %v2231_v1  ;;  %v2188_v11 = vor.u32 1.1754944e-38, %v2187_v48  ;;  %vm2186_vm4 = vcmp.eq.f32.partialorder %v2185_v61, 8.507059e+37 }
0x1196   :  { %v2640_v23 = vpop.eup %2639 }
0x1197   :  { %v2642_v35 = vpop.eup %2641  ;;  %v2117_v57 = vmul.f32 %v2640_v23, %v2115_v63  ;;  %vm2122_vm1 = vweird.f32 %v2640_v23 }
0x1198   :  { %v2644_v32 = vpop.eup %2643  ;;  %v2177_v20 = vmul.f32 %v2642_v35, %v2175_v37  ;;  %vm2182_vm12 = vweird.f32 %v2642_v35  ;;  %vm2123_vm15 = vmor %vm2121_vm13, %vm2122_vm1 }
0x1199   :  { %v2118_v59 = vsub.f32 1.0, %v2117_v57  ;;  %v2277_v3 = vadd.f32 1.0, %v2644_v32  ;;  %vm2183_vm2 = vmor %vm2181_vm14, %vm2182_vm12  ;;  %v2646_v46 = vpop.eup %2645 }
0x119a   :  { %v2178_v7 = vsub.f32 1.0, %v2177_v20 }
0x119b   :  { %v2119_v39 = vmul.f32 %v2640_v23, %v2118_v59  ;;  %2647 = vrcp.f32 %v2277_v3  ;;  %v2289_v51 = vand.u32 2147483648, %v2277_v3  ;;  %v2287_v56 = vand.u32 2147483647, %v2277_v3 }
0x119c   :  { %v2179_v50 = vmul.f32 %v2642_v35, %v2178_v7  ;;  %vm2283_vm7 = vweird.f32 %v2277_v3 }
0x119d   :  { %v2120_v42 = vadd.f32 %v2640_v23, %v2119_v39  ;;  %v2290_v4 = vor.u32 1.1754944e-38, %v2289_v51  ;;  %vm2288_vm8 = vcmp.eq.f32.partialorder %v2287_v56, 8.507059e+37 }
0x119e   :  { %v2180_v6 = vadd.f32 %v2642_v35, %v2179_v50 }
0x119f   :  { %v2124_v18 = vsel %vm2123_vm15, %v2640_v23, %v2120_v42 }
0x11a0   :  { %v2129_v14 = vsel %vm2126_vm3, %v2128_v54, %v2124_v18  ;;  %v2184_v25 = vsel %vm2183_vm2, %v2642_v35, %v2180_v6 }
0x11a1   :  { %v2648_v13 = vpop.eup %2647  ;;  %v2294_v22 = vmul.f32 %v2646_v46, %v2129_v14  ;;  %v2189_v5 = vsel %vm2186_vm4, %v2188_v11, %v2184_v25 }
0x11a2   :  { %v2279_v10 = vmul.f32 %v2648_v13, %v2277_v3  ;;  %v2293_v24 = vmul.f32 %v2189_v5, %v3460_v27  ;;  %vm2284_vm0 = vweird.f32 %v2648_v13 }
0x11a3   :  { %vm2285_vm6 = vmor %vm2283_vm7, %vm2284_vm0 }
0x11a4   :  { %v2280_v16 = vsub.f32 1.0, %v2279_v10  ;;  %v2295_v58 = vadd.f32 %v2294_v22, %v2293_v24 }
0x11a6   :  { %v2281_v34 = vmul.f32 %v2648_v13, %v2280_v16  ;;  %2649 = vtanh.f32 %v2295_v58 }
0x11a8   :  { %v2282_v30 = vadd.f32 %v2648_v13, %v2281_v34 }
0x11aa   :  { %v2286_v12 = vsel %vm2285_vm6, %v2648_v13, %v2282_v30 }
0x11ab   :  { %v2291_v33 = vsel %vm2288_vm8, %v2290_v4, %v2286_v12 }
0x11ac   :  { %v2650_v9 = vpop.eup %2649 }
0x11ad   :  { %v2297_v8 = vmul.f32 %v2650_v9, %v2291_v33 }
0x11af   :  { %2304 = vrot.lane.b32.xlu2 %v2297_v8, %s2825_s27 }
0x1209   :  { %v2305_v27 = vpop.permute.xlu2 %2304 }
0x120a   :  { %2307 = vst.msk [vmem:[#allocation11 + $0x8] sm:$0xff] %vm1241_vm5, %v2305_v27 }
0x120b   :  { %2329 = dma.vmem_to_hbm [thread:$0]  %s2325_s24, 256, %s2327_s3, [#allocation12]  }
0x120c   :  { %2815 = dma.done.wait [#allocation4], 128  }
0x120d   :  { %2816 = vsyncadd [#allocation4], 4294967168 }
0x120e   :  { %2817 = dma.done.wait [#allocation12], 256  }
0x120f   :  { %2818 = vsyncadd [#allocation12], 4294967040 }
0x1210   :  { %2338 = vsyncpa [#allocation3], 1 }
0x1211   :  { %2339 = vsyncpa [#allocation6], 1 }
0x1212   :  { %2340 = vsyncpa [#allocation9], 1 }
0x1213   :  { %2341 = vsyncpa [#allocation4], 1 }
0x1214   :  { %2342 = vsyncpa [#allocation12], 1 }

</bundles_post_ra>
